<compile_context>
chip_gen: v6e
topology: v6e:2x2x1
jax: 0.10.0
libtpu: 0.0.40
codegen_flags: <defaults>
</compile_context>

<pallas_src>
import functools

import jax
import jax.numpy as jnp
from jax import lax
from jax.experimental import pallas as pl
from jax.experimental.pallas import tpu as pltpu


def _fixup_block_kernel(params_ref, x_ref, w1_ref, w2_ref, mask_ref, o_ref,
                        *, W, compute_dtype):
    """One batch-fold (NB images side-by-side on the lane axis) per grid step.

    params_ref: SMEM (5,) f32   = [bias1a, bias1b, bias2a, scale, bias2b]
    x_ref:      VMEM (1, Cp, Lp) f32        (channel-padded, lane-dense spatial)
    w*_ref:     VMEM (9, Cp, Cp) compute-dtype  per-tap conv weight slabs
    mask_ref:   VMEM (9, Lp) compute-dtype  {0,1} tap-validity masks (per dest pixel)
    o_ref:      VMEM (1, Cp, Lp) f32
    """
    bias1a = params_ref[0]
    bias1b = params_ref[1]
    bias2a = params_ref[2]
    scale = params_ref[3]
    bias2b = params_ref[4]

    Lp = x_ref.shape[2]

    # Load the 9 tap masks once; reused by both convs.
    mrows = [mask_ref[t:t + 1, :] for t in range(9)]       # each (1, Lp)

    def conv3x3(v, w_ref):
        # v: (Cp, Lp) conv input in compute_dtype (pre-conv scalar bias already
        # added).  PyTorch zero-pads the biased tensor, so every out-of-image tap
        # is zeroed via the host-precomputed masks.  Returns f32 (Cp, Lp).
        acc = None
        for dy in range(3):
            for dx in range(3):
                t = dy * 3 + dx
                k = (dy - 1) * W + (dx - 1)                 # flattened spatial offset
                shifted = v if k == 0 else pltpu.roll(v, (-k) % Lp, axis=1)
                tap = shifted * mrows[t]                    # mask-out invalid taps
                d = jnp.dot(w_ref[t], tap, preferred_element_type=jnp.float32)
                acc = d if acc is None else acc + d
        return acc

    # conv1: out = relu(conv3x3(x + bias1a) + bias1b)
    v1 = (x_ref[0] + bias1a).astype(compute_dtype)
    out1 = jnp.maximum(conv3x3(v1, w1_ref) + bias1b, 0.0)

    # conv2 + fixup epilogue: out = relu(conv3x3(out1 + bias2a)*scale + bias2b + x)
    v2 = (out1 + bias2a).astype(compute_dtype)
    out2 = conv3x3(v2, w2_ref) * scale + bias2b + x_ref[0]  # re-read residual x
    o_ref[0] = jnp.maximum(out2, 0.0).astype(o_ref.dtype)


@functools.partial(jax.jit, static_argnames=("compute_dtype",))
def fixup_basic_block(x_nchw, w1_oihw, w2_oihw, params, *,
                      compute_dtype=jnp.bfloat16):
    """FixupBasicBlock forward (stride=1, downsample=None).

    x_nchw:  (N, C, H, W) f32          (PyTorch NCHW)
    w*_oihw: (C, C, 3, 3) f32          (PyTorch OIHW conv weights, bias=False)
    params:  (5,) f32 = [bias1a, bias1b, bias2a, scale, bias2b]
    compute_dtype: MXU operand dtype.  bf16 (default) is MXU-native on v5e/v6e/v7x;
                   jnp.float32 gives exact f32 matmuls.  Epilogue is always f32.
    """
    N, C, H, W = x_nchw.shape
    Cout, Cin = w1_oihw.shape[0], w1_oihw.shape[1]
    assert Cin == C and Cout == C, "no downsample -> inplanes == planes"

    HW = H * W
    HWp = ((HW + 127) // 128) * 128          # lane-dense per-image spatial axis
    Cp = max(8, ((C + 7) // 8) * 8)          # channel pad to f32 sublane granule

    # Fold NB images side-by-side along the lane axis of each grid step so the
    # matmul N dimension is NB*HWp (fills the wide MXU, amortizes step overhead).
    NB = max(1, min(N, 2048 // HWp))
    while N % NB:
        NB -= 1
    NBLK = N // NB
    Lp = NB * HWp

    # Activations: NCHW -> (NBLK, Cp, NB*HWp).  Padded channel rows get killed by
    # the zero-padded weight columns; padded spatial lanes / cross-image roll wrap
    # are killed by the destination-pixel tap masks.
    x3 = jnp.pad(x_nchw.reshape(N, C, HW), ((0, 0), (0, Cp - C), (0, HWp - HW)))
    x3 = x3.reshape(NBLK, NB, Cp, HWp).transpose(0, 2, 1, 3).reshape(NBLK, Cp, Lp)

    # Conv weights -> per-tap slabs: (9, Cp_out, Cp_in), tap t = ky*3 + kx.
    def fold_weight(w):
        wp = jnp.pad(w, ((0, Cp - Cout), (0, Cp - Cin), (0, 0), (0, 0)))
        return jnp.transpose(wp, (2, 3, 0, 1)).reshape(9, Cp, Cp).astype(compute_dtype)

    w1_p = fold_weight(w1_oihw)
    w2_p = fold_weight(w2_oihw)

    # Host-precomputed {0,1} tap-validity masks per destination pixel, tiled over
    # the NB folded images.  Replaces in-kernel integer compares + selects.
    p = jnp.arange(HWp, dtype=jnp.int32)
    h = p // W
    w = p % W
    inimg = p < HW
    rows = []
    for dy in (-1, 0, 1):
        for dx in (-1, 0, 1):
            rows.append(inimg & (h + dy >= 0) & (h + dy <= H - 1)
                        & (w + dx >= 0) & (w + dx <= W - 1))
    mask = jnp.stack(rows).astype(compute_dtype)          # (9, HWp)
    mask = jnp.tile(mask, (1, NB))                        # (9, Lp)

    grid_spec = pltpu.PrefetchScalarGridSpec(
        num_scalar_prefetch=0,
        grid=(NBLK,),
        in_specs=[
            pl.BlockSpec(memory_space=pltpu.MemorySpace.SMEM),      # params (5,)
            pl.BlockSpec((1, Cp, Lp), lambda b: (b, 0, 0)),         # x
            pl.BlockSpec((9, Cp, Cp), lambda b: (0, 0, 0)),         # w1 (resident)
            pl.BlockSpec((9, Cp, Cp), lambda b: (0, 0, 0)),         # w2 (resident)
            pl.BlockSpec((9, Lp), lambda b: (0, 0)),                # masks (resident)
        ],
        out_specs=pl.BlockSpec((1, Cp, Lp), lambda b: (b, 0, 0)),
    )

    out_p = pl.pallas_call(
        functools.partial(_fixup_block_kernel, W=W, compute_dtype=compute_dtype),
        out_shape=jax.ShapeDtypeStruct((NBLK, Cp, Lp), jnp.float32),
        grid_spec=grid_spec,
        compiler_params=pltpu.CompilerParams(
            dimension_semantics=("parallel",)),
    )(params, x3, w1_p, w2_p, mask)

    # Un-fold batch, drop channel / spatial padding.
    out = out_p.reshape(NBLK, Cp, NB, HWp).transpose(0, 2, 1, 3).reshape(N, Cp, HWp)
    return out[:, :C, :HW].reshape(N, C, H, W)


def fixup_basic_block_ref(x_nchw, w1_oihw, w2_oihw, params,
                          conv_dtype=jnp.float32):
    """Pure-JAX reference. conv_dtype lets us match the bf16-MXU kernel path."""
    b1a, b1b, b2a, scale, b2b = [params[i] for i in range(5)]
    dn = lax.conv_dimension_numbers(x_nchw.shape, w1_oihw.shape,
                                    ("NCHW", "OIHW", "NCHW"))

    def conv(inp, w):
        return lax.conv_general_dilated(
            inp.astype(conv_dtype), w.astype(conv_dtype), (1, 1), "SAME",
            dimension_numbers=dn, preferred_element_type=jnp.float32)

    out = conv(x_nchw + b1a, w1_oihw)
    out = jnp.maximum(out + b1b, 0.0)
    out = conv(out + b2a, w2_oihw)
    out = out * scale + b2b + x_nchw
    return jnp.maximum(out, 0.0)


if __name__ == "__main__":
    # Shapes consistent with the module: inplanes = planes = 4, stride = 1,
    # downsample = None  ->  x: (N=2, C=4, H=16, W=16) PyTorch NCHW.
    N, C, H, W = 2, 4, 16, 16

    key = jax.random.PRNGKey(0)
    kx, kw1, kw2, kx2 = jax.random.split(key, 4)

    x = jax.random.normal(kx, (N, C, H, W), dtype=jnp.float32)
    w1 = jax.random.normal(kw1, (C, C, 3, 3), dtype=jnp.float32) * 0.1
    w2 = jax.random.normal(kw2, (C, C, 3, 3), dtype=jnp.float32) * 0.1
    # [bias1a, bias1b, bias2a, scale, bias2b] — non-trivial so every path is exercised.
    params = jnp.array([0.10, -0.05, 0.02, 1.20, 0.03], dtype=jnp.float32)

    # Exact f32 MXU path vs pure f32 reference.
    out_f32 = jax.block_until_ready(
        fixup_basic_block(x, w1, w2, params, compute_dtype=jnp.float32))
    ref_f32 = fixup_basic_block_ref(x, w1, w2, params, conv_dtype=jnp.float32)
    assert out_f32.shape == (N, C, H, W), out_f32.shape
    err_f32 = float(jnp.max(jnp.abs(out_f32 - ref_f32)))
    assert jnp.allclose(out_f32, ref_f32, atol=1e-3, rtol=1e-3), err_f32

    # bf16 MXU path (default perf config on all generations) vs bf16-matched ref.
    out_bf16 = jax.block_until_ready(fixup_basic_block(x, w1, w2, params))
    ref_bf16 = fixup_basic_block_ref(x, w1, w2, params, conv_dtype=jnp.bfloat16)
    err_bf16 = float(jnp.max(jnp.abs(out_bf16 - ref_bf16)))
    assert jnp.allclose(out_bf16, ref_bf16, atol=2e-2, rtol=2e-2), err_bf16

    # Spatially-padded case (HW not a multiple of 128) — validates the roll+mask
    # invariant the review flagged as load-bearing (padded lanes hold junk that
    # must never reach real outputs), plus the batch-fold boundary masking.
    H2, W2 = 10, 10
    x_odd = jax.random.normal(kx2, (N, C, H2, W2), dtype=jnp.float32)
    out_odd = jax.block_until_ready(
        fixup_basic_block(x_odd, w1, w2, params, compute_dtype=jnp.float32))
    ref_odd = fixup_basic_block_ref(x_odd, w1, w2, params, conv_dtype=jnp.float32)
    err_odd = float(jnp.max(jnp.abs(out_odd - ref_odd)))
    assert jnp.allclose(out_odd, ref_odd, atol=1e-3, rtol=1e-3), err_odd

    print("KERNEL_OK")
</pallas_src>

<mosaic_0001>
module attributes {stable_mosaic.version = 11 : i64} {
  func.func @_fixup_block_kernel(%arg0: i32, %arg1: memref<5xf32, #tpu.memory_space<smem>>, %arg2: memref<1x8x512xf32, #tpu.memory_space<vmem>>, %arg3: memref<9x8x8xf32, #tpu.memory_space<vmem>>, %arg4: memref<9x8x8xf32, #tpu.memory_space<vmem>>, %arg5: memref<9x512xf32, #tpu.memory_space<vmem>>, %arg6: memref<1x8x512xf32, #tpu.memory_space<vmem>>) attributes {dimension_semantics = [#tpu.dimension_semantics<parallel>], iteration_bounds = array<i64: 1>, scalar_prefetch = 0 : i64, scratch_operands = 0 : i64, tpu.core_type = #tpu.core_type<tc>, window_params = [{transform_indices = @transform_0, window_bounds = array<i64: 5>}, {transform_indices = @transform_1, window_bounds = array<i64: 1, 8, 512>}, {pipeline_mode = #tpu.pipeline_mode<synchronous>, transform_indices = @transform_2, window_bounds = array<i64: 9, 8, 8>}, {pipeline_mode = #tpu.pipeline_mode<synchronous>, transform_indices = @transform_3, window_bounds = array<i64: 9, 8, 8>}, {pipeline_mode = #tpu.pipeline_mode<synchronous>, transform_indices = @transform_4, window_bounds = array<i64: 9, 512>}, {transform_indices = @transform_5, window_bounds = array<i64: 1, 8, 512>}]} {
    %c0 = arith.constant 0 : index
    %0 = memref.load %arg1[%c0] : memref<5xf32, #tpu.memory_space<smem>>
    %c1 = arith.constant 1 : index
    %1 = memref.load %arg1[%c1] : memref<5xf32, #tpu.memory_space<smem>>
    %c2 = arith.constant 2 : index
    %2 = memref.load %arg1[%c2] : memref<5xf32, #tpu.memory_space<smem>>
    %c3 = arith.constant 3 : index
    %3 = memref.load %arg1[%c3] : memref<5xf32, #tpu.memory_space<smem>>
    %c4 = arith.constant 4 : index
    %4 = memref.load %arg1[%c4] : memref<5xf32, #tpu.memory_space<smem>>
    %c0_0 = arith.constant 0 : index
    %c0_1 = arith.constant 0 : index
    %5 = vector.load %arg5[%c0_0, %c0_1] : memref<9x512xf32, #tpu.memory_space<vmem>>, vector<1x512xf32>
    %c1_2 = arith.constant 1 : index
    %c0_3 = arith.constant 0 : index
    %6 = vector.load %arg5[%c1_2, %c0_3] : memref<9x512xf32, #tpu.memory_space<vmem>>, vector<1x512xf32>
    %c2_4 = arith.constant 2 : index
    %c0_5 = arith.constant 0 : index
    %7 = vector.load %arg5[%c2_4, %c0_5] : memref<9x512xf32, #tpu.memory_space<vmem>>, vector<1x512xf32>
    %c3_6 = arith.constant 3 : index
    %c0_7 = arith.constant 0 : index
    %8 = vector.load %arg5[%c3_6, %c0_7] : memref<9x512xf32, #tpu.memory_space<vmem>>, vector<1x512xf32>
    %c4_8 = arith.constant 4 : index
    %c0_9 = arith.constant 0 : index
    %9 = vector.load %arg5[%c4_8, %c0_9] : memref<9x512xf32, #tpu.memory_space<vmem>>, vector<1x512xf32>
    %c5 = arith.constant 5 : index
    %c0_10 = arith.constant 0 : index
    %10 = vector.load %arg5[%c5, %c0_10] : memref<9x512xf32, #tpu.memory_space<vmem>>, vector<1x512xf32>
    %c6 = arith.constant 6 : index
    %c0_11 = arith.constant 0 : index
    %11 = vector.load %arg5[%c6, %c0_11] : memref<9x512xf32, #tpu.memory_space<vmem>>, vector<1x512xf32>
    %c7 = arith.constant 7 : index
    %c0_12 = arith.constant 0 : index
    %12 = vector.load %arg5[%c7, %c0_12] : memref<9x512xf32, #tpu.memory_space<vmem>>, vector<1x512xf32>
    %c8 = arith.constant 8 : index
    %c0_13 = arith.constant 0 : index
    %13 = vector.load %arg5[%c8, %c0_13] : memref<9x512xf32, #tpu.memory_space<vmem>>, vector<1x512xf32>
    %c0_14 = arith.constant 0 : index
    %c0_15 = arith.constant 0 : index
    %c0_16 = arith.constant 0 : index
    %14 = vector.load %arg2[%c0_14, %c0_15, %c0_16] : memref<1x8x512xf32, #tpu.memory_space<vmem>>, vector<1x8x512xf32>
    %15 = vector.shape_cast %14 : vector<1x8x512xf32> to vector<8x512xf32>
    %16 = vector.broadcast %0 : f32 to vector<8x512xf32>
    %17 = arith.addf %15, %16 : vector<8x512xf32>
    %c17_i32 = arith.constant 17 : i32
    %18 = tpu.dynamic_rotate %17 by %c17_i32 dim 1 : vector<8x512xf32>, i32 -> vector<8x512xf32>
    %19 = vector.broadcast %5 : vector<1x512xf32> to vector<8x512xf32>
    %20 = arith.mulf %18, %19 : vector<8x512xf32>
    %c0_17 = arith.constant 0 : index
    %c0_18 = arith.constant 0 : index
    %c0_19 = arith.constant 0 : index
    %21 = vector.load %arg3[%c0_17, %c0_18, %c0_19] : memref<9x8x8xf32, #tpu.memory_space<vmem>>, vector<1x8x8xf32>
    %22 = vector.shape_cast %21 : vector<1x8x8xf32> to vector<8x8xf32>
    %cst = arith.constant dense<0.000000e+00> : vector<8x512xf32>
    %23 = tpu.matmul %22, %20, %cst {dimension_numbers = #tpu.dot_dimension_numbers<[1], [0], [0], [1], [0, 0, 1, 1], [], []>} : vector<8x8xf32>, vector<8x512xf32>, vector<8x512xf32> -> vector<8x512xf32>
    %c16_i32 = arith.constant 16 : i32
    %24 = tpu.dynamic_rotate %17 by %c16_i32 dim 1 : vector<8x512xf32>, i32 -> vector<8x512xf32>
    %25 = vector.broadcast %6 : vector<1x512xf32> to vector<8x512xf32>
    %26 = arith.mulf %24, %25 : vector<8x512xf32>
    %c1_20 = arith.constant 1 : index
    %c0_21 = arith.constant 0 : index
    %c0_22 = arith.constant 0 : index
    %27 = vector.load %arg3[%c1_20, %c0_21, %c0_22] : memref<9x8x8xf32, #tpu.memory_space<vmem>>, vector<1x8x8xf32>
    %28 = vector.shape_cast %27 : vector<1x8x8xf32> to vector<8x8xf32>
    %cst_23 = arith.constant dense<0.000000e+00> : vector<8x512xf32>
    %29 = tpu.matmul %28, %26, %cst_23 {dimension_numbers = #tpu.dot_dimension_numbers<[1], [0], [0], [1], [0, 0, 1, 1], [], []>} : vector<8x8xf32>, vector<8x512xf32>, vector<8x512xf32> -> vector<8x512xf32>
    %30 = arith.addf %23, %29 : vector<8x512xf32>
    %c15_i32 = arith.constant 15 : i32
    %31 = tpu.dynamic_rotate %17 by %c15_i32 dim 1 : vector<8x512xf32>, i32 -> vector<8x512xf32>
    %32 = vector.broadcast %7 : vector<1x512xf32> to vector<8x512xf32>
    %33 = arith.mulf %31, %32 : vector<8x512xf32>
    %c2_24 = arith.constant 2 : index
    %c0_25 = arith.constant 0 : index
    %c0_26 = arith.constant 0 : index
    %34 = vector.load %arg3[%c2_24, %c0_25, %c0_26] : memref<9x8x8xf32, #tpu.memory_space<vmem>>, vector<1x8x8xf32>
    %35 = vector.shape_cast %34 : vector<1x8x8xf32> to vector<8x8xf32>
    %cst_27 = arith.constant dense<0.000000e+00> : vector<8x512xf32>
    %36 = tpu.matmul %35, %33, %cst_27 {dimension_numbers = #tpu.dot_dimension_numbers<[1], [0], [0], [1], [0, 0, 1, 1], [], []>} : vector<8x8xf32>, vector<8x512xf32>, vector<8x512xf32> -> vector<8x512xf32>
    %37 = arith.addf %30, %36 : vector<8x512xf32>
    %c1_i32 = arith.constant 1 : i32
    %38 = tpu.dynamic_rotate %17 by %c1_i32 dim 1 : vector<8x512xf32>, i32 -> vector<8x512xf32>
    %39 = vector.broadcast %8 : vector<1x512xf32> to vector<8x512xf32>
    %40 = arith.mulf %38, %39 : vector<8x512xf32>
    %c3_28 = arith.constant 3 : index
    %c0_29 = arith.constant 0 : index
    %c0_30 = arith.constant 0 : index
    %41 = vector.load %arg3[%c3_28, %c0_29, %c0_30] : memref<9x8x8xf32, #tpu.memory_space<vmem>>, vector<1x8x8xf32>
    %42 = vector.shape_cast %41 : vector<1x8x8xf32> to vector<8x8xf32>
    %cst_31 = arith.constant dense<0.000000e+00> : vector<8x512xf32>
    %43 = tpu.matmul %42, %40, %cst_31 {dimension_numbers = #tpu.dot_dimension_numbers<[1], [0], [0], [1], [0, 0, 1, 1], [], []>} : vector<8x8xf32>, vector<8x512xf32>, vector<8x512xf32> -> vector<8x512xf32>
    %44 = arith.addf %37, %43 : vector<8x512xf32>
    %45 = vector.broadcast %9 : vector<1x512xf32> to vector<8x512xf32>
    %46 = arith.mulf %17, %45 : vector<8x512xf32>
    %c4_32 = arith.constant 4 : index
    %c0_33 = arith.constant 0 : index
    %c0_34 = arith.constant 0 : index
    %47 = vector.load %arg3[%c4_32, %c0_33, %c0_34] : memref<9x8x8xf32, #tpu.memory_space<vmem>>, vector<1x8x8xf32>
    %48 = vector.shape_cast %47 : vector<1x8x8xf32> to vector<8x8xf32>
    %cst_35 = arith.constant dense<0.000000e+00> : vector<8x512xf32>
    %49 = tpu.matmul %48, %46, %cst_35 {dimension_numbers = #tpu.dot_dimension_numbers<[1], [0], [0], [1], [0, 0, 1, 1], [], []>} : vector<8x8xf32>, vector<8x512xf32>, vector<8x512xf32> -> vector<8x512xf32>
    %50 = arith.addf %44, %49 : vector<8x512xf32>
    %c511_i32 = arith.constant 511 : i32
    %51 = tpu.dynamic_rotate %17 by %c511_i32 dim 1 : vector<8x512xf32>, i32 -> vector<8x512xf32>
    %52 = vector.broadcast %10 : vector<1x512xf32> to vector<8x512xf32>
    %53 = arith.mulf %51, %52 : vector<8x512xf32>
    %c5_36 = arith.constant 5 : index
    %c0_37 = arith.constant 0 : index
    %c0_38 = arith.constant 0 : index
    %54 = vector.load %arg3[%c5_36, %c0_37, %c0_38] : memref<9x8x8xf32, #tpu.memory_space<vmem>>, vector<1x8x8xf32>
    %55 = vector.shape_cast %54 : vector<1x8x8xf32> to vector<8x8xf32>
    %cst_39 = arith.constant dense<0.000000e+00> : vector<8x512xf32>
    %56 = tpu.matmul %55, %53, %cst_39 {dimension_numbers = #tpu.dot_dimension_numbers<[1], [0], [0], [1], [0, 0, 1, 1], [], []>} : vector<8x8xf32>, vector<8x512xf32>, vector<8x512xf32> -> vector<8x512xf32>
    %57 = arith.addf %50, %56 : vector<8x512xf32>
    %c497_i32 = arith.constant 497 : i32
    %58 = tpu.dynamic_rotate %17 by %c497_i32 dim 1 : vector<8x512xf32>, i32 -> vector<8x512xf32>
    %59 = vector.broadcast %11 : vector<1x512xf32> to vector<8x512xf32>
    %60 = arith.mulf %58, %59 : vector<8x512xf32>
    %c6_40 = arith.constant 6 : index
    %c0_41 = arith.constant 0 : index
    %c0_42 = arith.constant 0 : index
    %61 = vector.load %arg3[%c6_40, %c0_41, %c0_42] : memref<9x8x8xf32, #tpu.memory_space<vmem>>, vector<1x8x8xf32>
    %62 = vector.shape_cast %61 : vector<1x8x8xf32> to vector<8x8xf32>
    %cst_43 = arith.constant dense<0.000000e+00> : vector<8x512xf32>
    %63 = tpu.matmul %62, %60, %cst_43 {dimension_numbers = #tpu.dot_dimension_numbers<[1], [0], [0], [1], [0, 0, 1, 1], [], []>} : vector<8x8xf32>, vector<8x512xf32>, vector<8x512xf32> -> vector<8x512xf32>
    %64 = arith.addf %57, %63 : vector<8x512xf32>
    %c496_i32 = arith.constant 496 : i32
    %65 = tpu.dynamic_rotate %17 by %c496_i32 dim 1 : vector<8x512xf32>, i32 -> vector<8x512xf32>
    %66 = vector.broadcast %12 : vector<1x512xf32> to vector<8x512xf32>
    %67 = arith.mulf %65, %66 : vector<8x512xf32>
    %c7_44 = arith.constant 7 : index
    %c0_45 = arith.constant 0 : index
    %c0_46 = arith.constant 0 : index
    %68 = vector.load %arg3[%c7_44, %c0_45, %c0_46] : memref<9x8x8xf32, #tpu.memory_space<vmem>>, vector<1x8x8xf32>
    %69 = vector.shape_cast %68 : vector<1x8x8xf32> to vector<8x8xf32>
    %cst_47 = arith.constant dense<0.000000e+00> : vector<8x512xf32>
    %70 = tpu.matmul %69, %67, %cst_47 {dimension_numbers = #tpu.dot_dimension_numbers<[1], [0], [0], [1], [0, 0, 1, 1], [], []>} : vector<8x8xf32>, vector<8x512xf32>, vector<8x512xf32> -> vector<8x512xf32>
    %71 = arith.addf %64, %70 : vector<8x512xf32>
    %c495_i32 = arith.constant 495 : i32
    %72 = tpu.dynamic_rotate %17 by %c495_i32 dim 1 : vector<8x512xf32>, i32 -> vector<8x512xf32>
    %73 = vector.broadcast %13 : vector<1x512xf32> to vector<8x512xf32>
    %74 = arith.mulf %72, %73 : vector<8x512xf32>
    %c8_48 = arith.constant 8 : index
    %c0_49 = arith.constant 0 : index
    %c0_50 = arith.constant 0 : index
    %75 = vector.load %arg3[%c8_48, %c0_49, %c0_50] : memref<9x8x8xf32, #tpu.memory_space<vmem>>, vector<1x8x8xf32>
    %76 = vector.shape_cast %75 : vector<1x8x8xf32> to vector<8x8xf32>
    %cst_51 = arith.constant dense<0.000000e+00> : vector<8x512xf32>
    %77 = tpu.matmul %76, %74, %cst_51 {dimension_numbers = #tpu.dot_dimension_numbers<[1], [0], [0], [1], [0, 0, 1, 1], [], []>} : vector<8x8xf32>, vector<8x512xf32>, vector<8x512xf32> -> vector<8x512xf32>
    %78 = arith.addf %71, %77 : vector<8x512xf32>
    %79 = vector.broadcast %1 : f32 to vector<8x512xf32>
    %80 = arith.addf %78, %79 : vector<8x512xf32>
    %cst_52 = arith.constant 0.000000e+00 : f32
    %81 = vector.broadcast %cst_52 : f32 to vector<8x512xf32>
    %82 = arith.maximumf %80, %81 : vector<8x512xf32>
    %83 = vector.broadcast %2 : f32 to vector<8x512xf32>
    %84 = arith.addf %82, %83 : vector<8x512xf32>
    %c17_i32_53 = arith.constant 17 : i32
    %85 = tpu.dynamic_rotate %84 by %c17_i32_53 dim 1 : vector<8x512xf32>, i32 -> vector<8x512xf32>
    %86 = vector.broadcast %5 : vector<1x512xf32> to vector<8x512xf32>
    %87 = arith.mulf %85, %86 : vector<8x512xf32>
    %c0_54 = arith.constant 0 : index
    %c0_55 = arith.constant 0 : index
    %c0_56 = arith.constant 0 : index
    %88 = vector.load %arg4[%c0_54, %c0_55, %c0_56] : memref<9x8x8xf32, #tpu.memory_space<vmem>>, vector<1x8x8xf32>
    %89 = vector.shape_cast %88 : vector<1x8x8xf32> to vector<8x8xf32>
    %cst_57 = arith.constant dense<0.000000e+00> : vector<8x512xf32>
    %90 = tpu.matmul %89, %87, %cst_57 {dimension_numbers = #tpu.dot_dimension_numbers<[1], [0], [0], [1], [0, 0, 1, 1], [], []>} : vector<8x8xf32>, vector<8x512xf32>, vector<8x512xf32> -> vector<8x512xf32>
    %c16_i32_58 = arith.constant 16 : i32
    %91 = tpu.dynamic_rotate %84 by %c16_i32_58 dim 1 : vector<8x512xf32>, i32 -> vector<8x512xf32>
    %92 = vector.broadcast %6 : vector<1x512xf32> to vector<8x512xf32>
    %93 = arith.mulf %91, %92 : vector<8x512xf32>
    %c1_59 = arith.constant 1 : index
    %c0_60 = arith.constant 0 : index
    %c0_61 = arith.constant 0 : index
    %94 = vector.load %arg4[%c1_59, %c0_60, %c0_61] : memref<9x8x8xf32, #tpu.memory_space<vmem>>, vector<1x8x8xf32>
    %95 = vector.shape_cast %94 : vector<1x8x8xf32> to vector<8x8xf32>
    %cst_62 = arith.constant dense<0.000000e+00> : vector<8x512xf32>
    %96 = tpu.matmul %95, %93, %cst_62 {dimension_numbers = #tpu.dot_dimension_numbers<[1], [0], [0], [1], [0, 0, 1, 1], [], []>} : vector<8x8xf32>, vector<8x512xf32>, vector<8x512xf32> -> vector<8x512xf32>
    %97 = arith.addf %90, %96 : vector<8x512xf32>
    %c15_i32_63 = arith.constant 15 : i32
    %98 = tpu.dynamic_rotate %84 by %c15_i32_63 dim 1 : vector<8x512xf32>, i32 -> vector<8x512xf32>
    %99 = vector.broadcast %7 : vector<1x512xf32> to vector<8x512xf32>
    %100 = arith.mulf %98, %99 : vector<8x512xf32>
    %c2_64 = arith.constant 2 : index
    %c0_65 = arith.constant 0 : index
    %c0_66 = arith.constant 0 : index
    %101 = vector.load %arg4[%c2_64, %c0_65, %c0_66] : memref<9x8x8xf32, #tpu.memory_space<vmem>>, vector<1x8x8xf32>
    %102 = vector.shape_cast %101 : vector<1x8x8xf32> to vector<8x8xf32>
    %cst_67 = arith.constant dense<0.000000e+00> : vector<8x512xf32>
    %103 = tpu.matmul %102, %100, %cst_67 {dimension_numbers = #tpu.dot_dimension_numbers<[1], [0], [0], [1], [0, 0, 1, 1], [], []>} : vector<8x8xf32>, vector<8x512xf32>, vector<8x512xf32> -> vector<8x512xf32>
    %104 = arith.addf %97, %103 : vector<8x512xf32>
    %c1_i32_68 = arith.constant 1 : i32
    %105 = tpu.dynamic_rotate %84 by %c1_i32_68 dim 1 : vector<8x512xf32>, i32 -> vector<8x512xf32>
    %106 = vector.broadcast %8 : vector<1x512xf32> to vector<8x512xf32>
    %107 = arith.mulf %105, %106 : vector<8x512xf32>
    %c3_69 = arith.constant 3 : index
    %c0_70 = arith.constant 0 : index
    %c0_71 = arith.constant 0 : index
    %108 = vector.load %arg4[%c3_69, %c0_70, %c0_71] : memref<9x8x8xf32, #tpu.memory_space<vmem>>, vector<1x8x8xf32>
    %109 = vector.shape_cast %108 : vector<1x8x8xf32> to vector<8x8xf32>
    %cst_72 = arith.constant dense<0.000000e+00> : vector<8x512xf32>
    %110 = tpu.matmul %109, %107, %cst_72 {dimension_numbers = #tpu.dot_dimension_numbers<[1], [0], [0], [1], [0, 0, 1, 1], [], []>} : vector<8x8xf32>, vector<8x512xf32>, vector<8x512xf32> -> vector<8x512xf32>
    %111 = arith.addf %104, %110 : vector<8x512xf32>
    %112 = vector.broadcast %9 : vector<1x512xf32> to vector<8x512xf32>
    %113 = arith.mulf %84, %112 : vector<8x512xf32>
    %c4_73 = arith.constant 4 : index
    %c0_74 = arith.constant 0 : index
    %c0_75 = arith.constant 0 : index
    %114 = vector.load %arg4[%c4_73, %c0_74, %c0_75] : memref<9x8x8xf32, #tpu.memory_space<vmem>>, vector<1x8x8xf32>
    %115 = vector.shape_cast %114 : vector<1x8x8xf32> to vector<8x8xf32>
    %cst_76 = arith.constant dense<0.000000e+00> : vector<8x512xf32>
    %116 = tpu.matmul %115, %113, %cst_76 {dimension_numbers = #tpu.dot_dimension_numbers<[1], [0], [0], [1], [0, 0, 1, 1], [], []>} : vector<8x8xf32>, vector<8x512xf32>, vector<8x512xf32> -> vector<8x512xf32>
    %117 = arith.addf %111, %116 : vector<8x512xf32>
    %c511_i32_77 = arith.constant 511 : i32
    %118 = tpu.dynamic_rotate %84 by %c511_i32_77 dim 1 : vector<8x512xf32>, i32 -> vector<8x512xf32>
    %119 = vector.broadcast %10 : vector<1x512xf32> to vector<8x512xf32>
    %120 = arith.mulf %118, %119 : vector<8x512xf32>
    %c5_78 = arith.constant 5 : index
    %c0_79 = arith.constant 0 : index
    %c0_80 = arith.constant 0 : index
    %121 = vector.load %arg4[%c5_78, %c0_79, %c0_80] : memref<9x8x8xf32, #tpu.memory_space<vmem>>, vector<1x8x8xf32>
    %122 = vector.shape_cast %121 : vector<1x8x8xf32> to vector<8x8xf32>
    %cst_81 = arith.constant dense<0.000000e+00> : vector<8x512xf32>
    %123 = tpu.matmul %122, %120, %cst_81 {dimension_numbers = #tpu.dot_dimension_numbers<[1], [0], [0], [1], [0, 0, 1, 1], [], []>} : vector<8x8xf32>, vector<8x512xf32>, vector<8x512xf32> -> vector<8x512xf32>
    %124 = arith.addf %117, %123 : vector<8x512xf32>
    %c497_i32_82 = arith.constant 497 : i32
    %125 = tpu.dynamic_rotate %84 by %c497_i32_82 dim 1 : vector<8x512xf32>, i32 -> vector<8x512xf32>
    %126 = vector.broadcast %11 : vector<1x512xf32> to vector<8x512xf32>
    %127 = arith.mulf %125, %126 : vector<8x512xf32>
    %c6_83 = arith.constant 6 : index
    %c0_84 = arith.constant 0 : index
    %c0_85 = arith.constant 0 : index
    %128 = vector.load %arg4[%c6_83, %c0_84, %c0_85] : memref<9x8x8xf32, #tpu.memory_space<vmem>>, vector<1x8x8xf32>
    %129 = vector.shape_cast %128 : vector<1x8x8xf32> to vector<8x8xf32>
    %cst_86 = arith.constant dense<0.000000e+00> : vector<8x512xf32>
    %130 = tpu.matmul %129, %127, %cst_86 {dimension_numbers = #tpu.dot_dimension_numbers<[1], [0], [0], [1], [0, 0, 1, 1], [], []>} : vector<8x8xf32>, vector<8x512xf32>, vector<8x512xf32> -> vector<8x512xf32>
    %131 = arith.addf %124, %130 : vector<8x512xf32>
    %c496_i32_87 = arith.constant 496 : i32
    %132 = tpu.dynamic_rotate %84 by %c496_i32_87 dim 1 : vector<8x512xf32>, i32 -> vector<8x512xf32>
    %133 = vector.broadcast %12 : vector<1x512xf32> to vector<8x512xf32>
    %134 = arith.mulf %132, %133 : vector<8x512xf32>
    %c7_88 = arith.constant 7 : index
    %c0_89 = arith.constant 0 : index
    %c0_90 = arith.constant 0 : index
    %135 = vector.load %arg4[%c7_88, %c0_89, %c0_90] : memref<9x8x8xf32, #tpu.memory_space<vmem>>, vector<1x8x8xf32>
    %136 = vector.shape_cast %135 : vector<1x8x8xf32> to vector<8x8xf32>
    %cst_91 = arith.constant dense<0.000000e+00> : vector<8x512xf32>
    %137 = tpu.matmul %136, %134, %cst_91 {dimension_numbers = #tpu.dot_dimension_numbers<[1], [0], [0], [1], [0, 0, 1, 1], [], []>} : vector<8x8xf32>, vector<8x512xf32>, vector<8x512xf32> -> vector<8x512xf32>
    %138 = arith.addf %131, %137 : vector<8x512xf32>
    %c495_i32_92 = arith.constant 495 : i32
    %139 = tpu.dynamic_rotate %84 by %c495_i32_92 dim 1 : vector<8x512xf32>, i32 -> vector<8x512xf32>
    %140 = vector.broadcast %13 : vector<1x512xf32> to vector<8x512xf32>
    %141 = arith.mulf %139, %140 : vector<8x512xf32>
    %c8_93 = arith.constant 8 : index
    %c0_94 = arith.constant 0 : index
    %c0_95 = arith.constant 0 : index
    %142 = vector.load %arg4[%c8_93, %c0_94, %c0_95] : memref<9x8x8xf32, #tpu.memory_space<vmem>>, vector<1x8x8xf32>
    %143 = vector.shape_cast %142 : vector<1x8x8xf32> to vector<8x8xf32>
    %cst_96 = arith.constant dense<0.000000e+00> : vector<8x512xf32>
    %144 = tpu.matmul %143, %141, %cst_96 {dimension_numbers = #tpu.dot_dimension_numbers<[1], [0], [0], [1], [0, 0, 1, 1], [], []>} : vector<8x8xf32>, vector<8x512xf32>, vector<8x512xf32> -> vector<8x512xf32>
    %145 = arith.addf %138, %144 : vector<8x512xf32>
    %146 = vector.broadcast %3 : f32 to vector<8x512xf32>
    %147 = arith.mulf %145, %146 : vector<8x512xf32>
    %148 = vector.broadcast %4 : f32 to vector<8x512xf32>
    %149 = arith.addf %147, %148 : vector<8x512xf32>
    %c0_97 = arith.constant 0 : index
    %c0_98 = arith.constant 0 : index
    %c0_99 = arith.constant 0 : index
    %150 = vector.load %arg2[%c0_97, %c0_98, %c0_99] : memref<1x8x512xf32, #tpu.memory_space<vmem>>, vector<1x8x512xf32>
    %151 = vector.shape_cast %150 : vector<1x8x512xf32> to vector<8x512xf32>
    %152 = arith.addf %149, %151 : vector<8x512xf32>
    %cst_100 = arith.constant 0.000000e+00 : f32
    %153 = vector.broadcast %cst_100 : f32 to vector<8x512xf32>
    %154 = arith.maximumf %152, %153 : vector<8x512xf32>
    %c0_101 = arith.constant 0 : index
    %c0_102 = arith.constant 0 : index
    %c0_103 = arith.constant 0 : index
    %155 = vector.load %arg6[%c0_101, %c0_102, %c0_103] : memref<1x8x512xf32, #tpu.memory_space<vmem>>, vector<1x8x512xf32>
    %156 = vector.shape_cast %155 : vector<1x8x512xf32> to vector<8x512xf32>
    %157 = vector.shape_cast %154 : vector<8x512xf32> to vector<1x8x512xf32>
    tpu.vector_store %arg6[%c0_101, %c0_102, %c0_103], %157 {strides = array<i32>} : memref<1x8x512xf32, #tpu.memory_space<vmem>>, vector<1x8x512xf32>,
    return
  }
  func.func @transform_0(%arg0: i32) -> i32 {
    %c0_i32 = arith.constant 0 : i32
    %c0_i32_0 = arith.constant 0 : i32
    return %c0_i32 : i32
  }
  func.func @transform_1(%arg0: i32) -> (i32, i32, i32) {
    %c0_i32 = arith.constant 0 : i32
    %c0_i32_0 = arith.constant 0 : i32
    %c0_i32_1 = arith.constant 0 : i32
    return %arg0, %c0_i32, %c0_i32_0 : i32, i32, i32
  }
  func.func @transform_2(%arg0: i32) -> (i32, i32, i32) {
    %c0_i32 = arith.constant 0 : i32
    %c0_i32_0 = arith.constant 0 : i32
    %c0_i32_1 = arith.constant 0 : i32
    %c0_i32_2 = arith.constant 0 : i32
    return %c0_i32, %c0_i32_0, %c0_i32_1 : i32, i32, i32
  }
  func.func @transform_3(%arg0: i32) -> (i32, i32, i32) {
    %c0_i32 = arith.constant 0 : i32
    %c0_i32_0 = arith.constant 0 : i32
    %c0_i32_1 = arith.constant 0 : i32
    %c0_i32_2 = arith.constant 0 : i32
    return %c0_i32, %c0_i32_0, %c0_i32_1 : i32, i32, i32
  }
  func.func @transform_4(%arg0: i32) -> (i32, i32) {
    %c0_i32 = arith.constant 0 : i32
    %c0_i32_0 = arith.constant 0 : i32
    %c0_i32_1 = arith.constant 0 : i32
    return %c0_i32, %c0_i32_0 : i32, i32
  }
  func.func @transform_5(%arg0: i32) -> (i32, i32, i32) {
    %c0_i32 = arith.constant 0 : i32
    %c0_i32_0 = arith.constant 0 : i32
    %c0_i32_1 = arith.constant 0 : i32
    return %arg0, %c0_i32, %c0_i32_0 : i32, i32, i32
  }
}

</mosaic_0001>

<bundles_post_ra>
// kernel: fixup_basic_block.1
= control target key start
LH: loop header
LB: loop body
LE: loop exit
PB: predicated region body
PF: predicated region fallthrough
CT: control target
= control target key end

     0   :  { %10 = vsyncpa [#allocation3], 0  ;;  %s4071_s0 = inlined_call_operand.vmem [shape: f32[5], index: 0, kind: input, shape index: {}]   ;;  %s4072_s1 = inlined_call_operand.vmem [shape: f32[1,8,512], index: 1, kind: input, shape index: {}]   ;;  %s4073_s2 = inlined_call_operand.vmem [shape: f32[9,8,8], index: 2, kind: input, shape index: {}]   ;;  %s4074_s3 = inlined_call_operand.vmem [shape: f32[9,8,8], index: 3, kind: input, shape index: {}]   ;;  %s4075_s4 = inlined_call_operand.vmem [shape: f32[9,512], index: 4, kind: input, shape index: {}]   ;;  %s4076_s5 = inlined_call_operand.vmem [shape: f32[1,8,512], index: 5, kind: output, shape index: {}]  }
   0x1   :  { %s17_s20 = sshll.u32 %s4071_s0, 4  ;;  %s18_s20 = int_to_ptr.vmem [resolvable:$true] %s17_s20 }
   0x2   :  { %s3347_s21 = scalar_lea.vmem %s18_s20, 16  ;;  %p3352_p1 = scmp.lt.s32.totalorder %s18_s20, %s18_s20 }
   0x3   :  { %p3348_p0 = scmp.ne.s32.totalorder %s18_s20, %s3347_s21  ;;  %p3353_p2 = scmp.lt.s32.totalorder %s3347_s21, %s3347_s21 }
   0x5   :  { %p3354_p3 = por %p3353_p2, %p3352_p1 }
   0x7   :  { %p3355_p4 = pnand %p3354_p3, %p3348_p0 }
   0x9   :  { %3358 = shalt.err (!%p3355_p4)
}
   0xa   :  { %s3361_s22 = smov [#allocation2]  }
   0xb   :  { %20 = dma.vmem_to_smem %s18_s20, 16, %s3361_s22, [#allocation3]  }
   0xc   :  { %3359 = dma.done.wait [#allocation3], 16  }
   0xd   :  { %3360 = vsyncadd [#allocation3], 4294967280 }
   0xe   :  { %32 = sfence }
   0xf   :  { %s33_s23 = sld [smem:[#allocation2]]  ;;  %v57_v0 = vld [vmem:[%s4072_s1 + $0x10] sm:$0xff]  ;;  %v55_v1 = vld [vmem:[%s4072_s1] sm:$0xff]  ;;  %v58_v3 = vld [vmem:[%s4072_s1 + $0x18] sm:$0xff]  ;;  %s3362_s6 = smov 16   ;;  %v4077_v9 = vmov 0.0   ;;  %v72_v10 = vlaneseq }
  0x10   :  { %v56_v4 = vld [vmem:[%s4072_s1 + $0x8] sm:$0xff]  ;;  %213 = vmatprep.mubr.f32.mxu0 %v4077_v9  ;;  %284 = vmatprep.mubr.f32.mxu1 %v4077_v9  ;;  %s3364_s7 = smov 17   ;;  %s3365_s8 = smov 15   ;;  %vm145_vm2 = vcmask 64512   ;;  %v104_v54 = vld [vmem:[%s4073_s2] sm:$0xff] }
  0x11   :  { %s3366_s9 = smov 1   ;;  %s3367_s10 = smov 127   ;;  %v81_v11 = vshrl.u32 %v72_v10, 7  ;;  %v3490_v12 = vand.u32 127, %v72_v10  ;;  %v3281_v36 = vld [vmem:[%s4073_s2 + $0x8] sm:$0xff] }
  0x12   :  { %s3368_s11 = smov 113   ;;  %s3369_s12 = smov 112   ;;  %v3273_v17 = vld [vmem:[%s4075_s4 + $0x1] ss:$8 sm:$0xf] }
  0x13   :  { %s3370_s13 = smov 111   ;;  %v3492_v13 = vsub.s32 3, %v81_v11  ;;  %v3494_v14 = vsub.s32 1, %v81_v11  ;;  %v3496_v15 = vsub.s32 0, %v81_v11  ;;  %v3498_v16 = vsub.s32 2, %v81_v11  ;;  %s3270_s30 = sld [smem:[#allocation2 + $0x2]] }
  0x14   :  { %vm113_vm0 = vcmp.lt.s32.totalorder %v3490_v12, 16  ;;  %v38_v20 = vld [vmem:[%s4075_s4] ss:$8 sm:$0xf]  ;;  %vm74_vm1 = vcmp.lt.s32.totalorder %v3490_v12, 17  ;;  %vm444_vm3 = vcmp.lt.s32.totalorder %v3490_v12, 15 }
  0x15   :  { %v59_v2 = vstv %s33_s23  ;;  %v3508_v21 = vrot.slane %v3273_v17, %v3492_v13  ;;  %v3511_v22 = vrot.slane %v3273_v17, %v3494_v14  ;;  %v3514_v23 = vrot.slane %v3273_v17, %v3496_v15  ;;  %v3274_v44 = vld [vmem:[%s4075_s4 + $0x2] ss:$8 sm:$0xf]  ;;  %v3275_v62 = vld [vmem:[%s4075_s4 + $0x3] ss:$8 sm:$0xf] }
  0x16   :  { %v3416_v5 = vadd.f32 %v59_v2, %v57_v0  ;;  %v3418_v6 = vadd.f32 %v59_v2, %v55_v1  ;;  %v3424_v7 = vadd.f32 %v59_v2, %v58_v3  ;;  %v3426_v8 = vadd.f32 %v59_v2, %v56_v4  ;;  %s3272_s24 = sld [smem:[#allocation2 + $0x4]] }
  0x17   :  { %v3517_v24 = vrot.slane %v3273_v17, %v3498_v16  ;;  %v3521_v27 = vrot.slane %v38_v20, %v3494_v14  ;;  %v3541_v40 = vrot.slane %v38_v20, %v3496_v15  ;;  %v3545_v42 = vrot.slane %v38_v20, %v3498_v16 }
  0x18   :  { %109 = vrot.lane.b32.xlu1 %v3416_v5, %s3362_s6  ;;  %105 = vrot.lane.b32.xlu0 %v3418_v6, %s3362_s6  ;;  %v3548_v43 = vrot.slane %v38_v20, %v3492_v13  ;;  %v3568_v53 = vrot.slane %v3274_v44, %v3494_v14  ;;  %v3576_v58 = vrot.slane %v3274_v44, %v3496_v15  ;;  %vm633_vm4 = vcmp.lt.s32.totalorder %v3490_v12, 1 }
  0x19   :  { %v3581_v60 = vrot.slane %v3274_v44, %v3498_v16  ;;  %v3584_v61 = vrot.slane %v3274_v44, %v3492_v13  ;;  %v3603_v17 = vrot.slane %v3275_v62, %v3494_v14  ;;  %vm998_vm5 = vcmp.lt.s32.totalorder %v3490_v12, 127 }
  0x1a   :  { %vm1187_vm6 = vcmp.lt.s32.totalorder %v3490_v12, 113  ;;  %vm1376_vm7 = vcmp.lt.s32.totalorder %v3490_v12, 112  ;;  %vm1565_vm8 = vcmp.lt.s32.totalorder %v3490_v12, 111 }
  0x1c   :  { %111 = vrot.lane.b32.xlu1 %v3424_v7, %s3362_s6  ;;  %107 = vrot.lane.b32.xlu0 %v3426_v8, %s3362_s6 }
  0x20   :  { %66 = vrot.lane.b32.xlu1 %v3426_v8, %s3364_s7  ;;  %64 = vrot.lane.b32.xlu0 %v3418_v6, %s3364_s7 }
  0x24   :  { %70 = vrot.lane.b32.xlu1 %v3424_v7, %s3364_s7  ;;  %68 = vrot.lane.b32.xlu0 %v3416_v5, %s3364_s7 }
  0x28   :  { %438 = vrot.lane.b32.xlu1 %v3426_v8, %s3365_s8  ;;  %436 = vrot.lane.b32.xlu0 %v3418_v6, %s3365_s8 }
  0x2c   :  { %442 = vrot.lane.b32.xlu1 %v3424_v7, %s3365_s8  ;;  %440 = vrot.lane.b32.xlu0 %v3416_v5, %s3365_s8 }
  0x30   :  { %627 = vrot.lane.b32.xlu1 %v3426_v8, %s3366_s9  ;;  %625 = vrot.lane.b32.xlu0 %v3418_v6, %s3366_s9 }
  0x34   :  { %631 = vrot.lane.b32.xlu1 %v3424_v7, %s3366_s9  ;;  %629 = vrot.lane.b32.xlu0 %v3416_v5, %s3366_s9 }
  0x38   :  { %992 = vrot.lane.b32.xlu1 %v3426_v8, %s3367_s10  ;;  %990 = vrot.lane.b32.xlu0 %v3418_v6, %s3367_s10 }
  0x3c   :  { %996 = vrot.lane.b32.xlu1 %v3424_v7, %s3367_s10  ;;  %994 = vrot.lane.b32.xlu0 %v3416_v5, %s3367_s10 }
  0x40   :  { %1181 = vrot.lane.b32.xlu1 %v3426_v8, %s3368_s11  ;;  %1179 = vrot.lane.b32.xlu0 %v3418_v6, %s3368_s11 }
  0x44   :  { %1185 = vrot.lane.b32.xlu1 %v3424_v7, %s3368_s11  ;;  %1183 = vrot.lane.b32.xlu0 %v3416_v5, %s3368_s11 }
  0x48   :  { %1370 = vrot.lane.b32.xlu1 %v3426_v8, %s3369_s12  ;;  %1368 = vrot.lane.b32.xlu0 %v3418_v6, %s3369_s12 }
  0x4c   :  { %1374 = vrot.lane.b32.xlu1 %v3424_v7, %s3369_s12  ;;  %1372 = vrot.lane.b32.xlu0 %v3416_v5, %s3369_s12 }
  0x50   :  { %1559 = vrot.lane.b32.xlu1 %v3426_v8, %s3370_s13  ;;  %1557 = vrot.lane.b32.xlu0 %v3418_v6, %s3370_s13 }
  0x54   :  { %1563 = vrot.lane.b32.xlu1 %v3424_v7, %s3370_s13  ;;  %1561 = vrot.lane.b32.xlu0 %v3416_v5, %s3370_s13 }
  0x8a   :  { %v110_v18 = vpop.permute.xlu1 %109  ;;  %v106_v19 = vpop.permute.xlu0 %105 }
  0x8e   :  { %v112_v25 = vpop.permute.xlu1 %111  ;;  %v108_v26 = vpop.permute.xlu0 %107 }
  0x8f   :  { %v117_v28 = vsel %vm113_vm0, %v112_v25, %v106_v19  ;;  %v115_v29 = vsel %vm113_vm0, %v108_v26, %v110_v18  ;;  %v114_v30 = vsel %vm113_vm0, %v110_v18, %v112_v25  ;;  %v116_v31 = vsel %vm113_vm0, %v106_v19, %v108_v26  ;;  %v3286_v18 = vld [vmem:[%s4073_s2 + $0x10] sm:$0xff] }
  0x90   :  { %v142_v32 = vmul.f32 %v3508_v21, %v114_v30  ;;  %v140_v33 = vmul.f32 %v3511_v22, %v116_v31  ;;  %v139_v34 = vmul.f32 %v3514_v23, %v117_v28  ;;  %v141_v35 = vmul.f32 %v3517_v24, %v115_v29  ;;  %v3276_v19 = vld [vmem:[%s4075_s4 + $0x4] ss:$8 sm:$0xf] }
  0x91   :  { %v3614_v28 = vrot.slane %v3275_v62, %v3496_v15  ;;  %v3617_v29 = vrot.slane %v3275_v62, %v3498_v16  ;;  %v3622_v31 = vrot.slane %v3275_v62, %v3492_v13 }
  0x92   :  { %250 = vmatprep.subr.mxu1 %v142_v32  ;;  %v67_v37 = vpop.permute.xlu1 %66  ;;  %179 = vmatprep.subr.mxu0 %v140_v33  ;;  %v65_v38 = vpop.permute.xlu0 %64  ;;  %v3627_v32 = vrot.slane %v3276_v19, %v3494_v14  ;;  %v3631_v33 = vrot.slane %v3276_v19, %v3496_v15 }
  0x93   :  { %v77_v39 = vsel %vm74_vm1, %v65_v38, %v67_v37  ;;  %180 = vmatpush1.msra.mxu0 %v139_v34  ;;  %251 = vmatpush1.msra.mxu1 %v141_v35 }
  0x94   :  { %v101_v41 = vmul.f32 %v3521_v27, %v77_v39  ;;  %3282 = vmatmul.mubr.msk.f32.vlgmr.msra.gmra.mxu0 %vm145_vm2, %v3281_v36  ;;  %3283 = vmatmul.mubr.msk.f32.vlgmr.msra.gmra.mxu1 %vm145_vm2, %v3281_v36  ;;  %v3634_v36 = vrot.slane %v3276_v19, %v3492_v13 }
  0x95   :  { %358 = vmatprep.mubr.f32.mxu0 %v4077_v9  ;;  %429 = vmatprep.mubr.f32.mxu1 %v4077_v9 }
  0x96   :  { %v71_v45 = vpop.permute.xlu1 %70  ;;  %324 = vmatprep.subr.mxu0 %v101_v41  ;;  %v69_v46 = vpop.permute.xlu0 %68  ;;  %v3643_v41 = vrot.slane %v3276_v19, %v3498_v16  ;;  %v3278_v19 = vld [vmem:[%s4075_s4 + $0x6] ss:$8 sm:$0xf] }
  0x97   :  { %v78_v47 = vsel %vm74_vm1, %v71_v45, %v65_v38  ;;  %v75_v48 = vsel %vm74_vm1, %v69_v46, %v71_v45  ;;  %v76_v49 = vsel %vm74_vm1, %v67_v37, %v69_v46 }
  0x98   :  { %v100_v50 = vmul.f32 %v3541_v40, %v78_v47  ;;  %v102_v51 = vmul.f32 %v3545_v42, %v76_v49  ;;  %v103_v52 = vmul.f32 %v3548_v43, %v75_v48  ;;  %v3289_v47 = vld [vmem:[%s4073_s2 + $0x18] sm:$0xff]  ;;  %v836_v48 = vmul.f32 %v3627_v32, %v3426_v8 }
  0x99   :  { %v835_v49 = vmul.f32 %v3631_v33, %v3418_v6  ;;  %v837_v8 = vmul.f32 %v3643_v41, %v3416_v5 }
  0x9a   :  { %v439_v55 = vpop.permute.xlu1 %438  ;;  %325 = vmatpush1.msra.mxu0 %v100_v50  ;;  %395 = vmatprep.subr.mxu1 %v103_v52  ;;  %v437_v56 = vpop.permute.xlu0 %436 }
  0x9b   :  { %v447_v57 = vsel %vm444_vm3, %v437_v56, %v439_v55  ;;  %396 = vmatpush1.msra.mxu1 %v102_v51  ;;  %3284 = vmatmul.mubr.msk.f32.vlgmr.msra.gmra.mxu0 %vm145_vm2, %v104_v54  ;;  %v3277_v51 = vld [vmem:[%s4075_s4 + $0x5] ss:$8 sm:$0xf] }
  0x9c   :  { %v471_v59 = vmul.f32 %v3568_v53, %v447_v57  ;;  %3285 = vmatmul.mubr.msk.f32.vlgmr.msra.gmra.mxu1 %vm145_vm2, %v104_v54  ;;  %543 = vmatprep.mubr.f32.mxu0 %v4077_v9  ;;  %v838_v54 = vmul.f32 %v3634_v36, %v3424_v7  ;;  %v3665_v6 = vrot.slane %v3277_v51, %v3492_v13  ;;  %v3292_v7 = vld [vmem:[%s4073_s2 + $0x20] sm:$0xff] }
  0x9d   :  { %614 = vmatprep.mubr.f32.mxu1 %v4077_v9  ;;  %v3678_v57 = vrot.slane %v3277_v51, %v3496_v15 }
  0x9e   :  { %v443_v63 = vpop.permute.xlu1 %442  ;;  %509 = vmatprep.subr.mxu0 %v471_v59  ;;  %v441_v0 = vpop.permute.xlu0 %440  ;;  %4092 = vst [vmem:[#allocation5_spill] sm:$0xff] %v3665_v6 }
  0x9f   :  { %v448_v1 = vsel %vm444_vm3, %v443_v63, %v437_v56  ;;  %v445_v2 = vsel %vm444_vm3, %v441_v0, %v443_v63  ;;  %v446_v3 = vsel %vm444_vm3, %v439_v55, %v441_v0  ;;  %v3669_v55 = vrot.slane %v3277_v51, %v3494_v14 }
  0xa0   :  { %v470_v4 = vmul.f32 %v3576_v58, %v448_v1  ;;  %v472_v10 = vmul.f32 %v3581_v60, %v446_v3  ;;  %v473_v11 = vmul.f32 %v3584_v61, %v445_v2  ;;  %v3672_v56 = vrot.slane %v3277_v51, %v3498_v16 }
  0xa2   :  { %v628_v20 = vpop.permute.xlu1 %627  ;;  %510 = vmatpush1.msra.mxu0 %v470_v4  ;;  %580 = vmatprep.subr.mxu1 %v473_v11  ;;  %v626_v25 = vpop.permute.xlu0 %625  ;;  %v3295_v11 = vld [vmem:[%s4073_s2 + $0x28] sm:$0xff] }
  0xa3   :  { %v636_v26 = vsel %vm633_vm4, %v626_v25, %v628_v20  ;;  %581 = vmatpush1.msra.mxu1 %v472_v10  ;;  %3287 = vmatmul.mubr.msk.f32.vlgmr.msra.gmra.mxu0 %vm145_vm2, %v3286_v18 }
  0xa4   :  { %v660_v30 = vmul.f32 %v3603_v17, %v636_v26  ;;  %3288 = vmatmul.mubr.msk.f32.vlgmr.msra.gmra.mxu1 %vm145_vm2, %v3286_v18  ;;  %732 = vmatprep.mubr.f32.mxu0 %v4077_v9  ;;  %v3711_v26 = vrot.slane %v3278_v19, %v3494_v14 }
  0xa5   :  { %803 = vmatprep.mubr.f32.mxu1 %v4077_v9 }
  0xa6   :  { %v632_v34 = vpop.permute.xlu1 %631  ;;  %698 = vmatprep.subr.mxu0 %v660_v30  ;;  %v630_v35 = vpop.permute.xlu0 %629  ;;  %4094 = vst [vmem:[#allocation7_spill] sm:$0xff] %v3711_v26  ;;  %v3714_v30 = vrot.slane %v3278_v19, %v3498_v16 }
  0xa7   :  { %v637_v37 = vsel %vm633_vm4, %v632_v34, %v626_v25  ;;  %v634_v38 = vsel %vm633_vm4, %v630_v35, %v632_v34  ;;  %v635_v39 = vsel %vm633_vm4, %v628_v20, %v630_v35  ;;  %v3707_v25 = vrot.slane %v3278_v19, %v3492_v13 }
  0xa8   :  { %v659_v44 = vmul.f32 %v3614_v28, %v637_v37  ;;  %v661_v45 = vmul.f32 %v3617_v29, %v635_v39  ;;  %v662_v46 = vmul.f32 %v3622_v31, %v634_v38  ;;  %4095 = vst [vmem:[#allocation8_spill] sm:$0xff] %v3714_v30  ;;  %v3717_v34 = vrot.slane %v3278_v19, %v3496_v15  ;;  %v3301_v19 = vld [vmem:[%s4073_s2 + $0x38] sm:$0xff] }
  0xa9   :  { %4093 = vst [vmem:[#allocation6_spill] sm:$0xff] %v3707_v25 }
  0xaa   :  { %v993_v50 = vpop.permute.xlu1 %992  ;;  %699 = vmatpush1.msra.mxu0 %v659_v44  ;;  %769 = vmatprep.subr.mxu1 %v662_v46  ;;  %v991_v52 = vpop.permute.xlu0 %990  ;;  %4096 = vst [vmem:[#allocation9_spill] sm:$0xff] %v3717_v34 }
  0xab   :  { %770 = vmatpush1.msra.mxu1 %v661_v45  ;;  %3290 = vmatmul.mubr.msk.f32.vlgmr.msra.gmra.mxu0 %vm145_vm2, %v3289_v47  ;;  %v1001_v5 = vsel %vm998_vm5, %v991_v52, %v993_v50 }
  0xac   :  { %3291 = vmatmul.mubr.msk.f32.vlgmr.msra.gmra.mxu1 %vm145_vm2, %v3289_v47  ;;  %874 = vmatprep.subr.mxu0 %v836_v48  ;;  %v1024_v10 = vmul.f32 %v3678_v57, %v1001_v5 }
  0xad   :  { %875 = vmatpush1.msra.mxu0 %v835_v49  ;;  %908 = vmatprep.mubr.f32.mxu0 %v4077_v9 }
  0xae   :  { %v997_v59 = vpop.permute.xlu1 %996  ;;  %v995_v62 = vpop.permute.xlu0 %994  ;;  %945 = vmatprep.subr.mxu1 %v838_v54  ;;  %979 = vmatprep.mubr.f32.mxu1 %v4077_v9 }
  0xaf   :  { %v1002_v63 = vsel %vm998_vm5, %v997_v59, %v991_v52  ;;  %v999_v0 = vsel %vm998_vm5, %v995_v62, %v997_v59  ;;  %v1000_v1 = vsel %vm998_vm5, %v993_v50, %v995_v62  ;;  %3293 = vmatmul.mubr.msk.f32.vlgmr.msra.gmra.mxu0 %vm145_vm2, %v3292_v7  ;;  %946 = vmatpush1.msra.mxu1 %v837_v8  ;;  %v3298_v50 = vld [vmem:[%s4073_s2 + $0x30] sm:$0xff] }
  0xb0   :  { %v1027_v2 = vmul.f32 %v3665_v6, %v1002_v63  ;;  %v1025_v3 = vmul.f32 %v3669_v55, %v1000_v1  ;;  %v1026_v4 = vmul.f32 %v3672_v56, %v999_v0  ;;  %3294 = vmatmul.mubr.msk.f32.vlgmr.msra.gmra.mxu1 %vm145_vm2, %v3292_v7  ;;  %1097 = vmatprep.mubr.f32.mxu0 %v4077_v9  ;;  %v3279_v52 = vld [vmem:[%s4075_s4 + $0x7] ss:$8 sm:$0xf] }
  0xb1   :  { %1168 = vmatprep.mubr.f32.mxu1 %v4077_v9  ;;  %v3743_v8 = vrot.slane %v3279_v52, %v3492_v13  ;;  %v3746_v7 = vrot.slane %v3279_v52, %v3494_v14  ;;  %v3749_v5 = vrot.slane %v3279_v52, %v3498_v16  ;;  %v3752_v59 = vrot.slane %v3279_v52, %v3496_v15  ;;  %v3304_v52 = vld [vmem:[%s4073_s2 + $0x40] sm:$0xff]  ;;  %s3269_s2 = sld [smem:[#allocation2 + $0x1]] }
  0xb2   :  { %v1182_v18 = vpop.permute.xlu1 %1181  ;;  %1134 = vmatprep.subr.mxu1 %v1027_v2  ;;  %v1180_v20 = vpop.permute.xlu0 %1179  ;;  %1063 = vmatprep.subr.mxu0 %v1025_v3 }
  0xb3   :  { %1064 = vmatpush1.msra.mxu0 %v1024_v10  ;;  %1135 = vmatpush1.msra.mxu1 %v1026_v4  ;;  %v1190_v35 = vsel %vm1187_vm6, %v1180_v20, %v1182_v18  ;;  %4097 = vst [vmem:[#allocation10_spill] sm:$0xff] %v3743_v8  ;;  %4098 = vst [vmem:[#allocation11_spill] sm:$0xff] %v3746_v7 }
  0xb4   :  { %3296 = vmatmul.mubr.msk.f32.vlgmr.msra.gmra.mxu0 %vm145_vm2, %v3295_v11  ;;  %3297 = vmatmul.mubr.msk.f32.vlgmr.msra.gmra.mxu1 %vm145_vm2, %v3295_v11  ;;  %v1213_v49 = vmul.f32 %v3717_v34, %v1190_v35  ;;  %4099 = vst [vmem:[#allocation12_spill] sm:$0xff] %v3749_v5  ;;  %4100 = vst [vmem:[#allocation13_spill] sm:$0xff] %v3752_v59  ;;  %v3280_v35 = vld [vmem:[%s4075_s4 + $0x20] ss:$8 sm:$0xf] }
  0xb5   :  { %1286 = vmatprep.mubr.f32.mxu0 %v4077_v9  ;;  %1357 = vmatprep.mubr.f32.mxu1 %v4077_v9 }
  0xb6   :  { %v1186_v37 = vpop.permute.xlu1 %1185  ;;  %v1184_v38 = vpop.permute.xlu0 %1183 }
  0xb7   :  { %v1191_v39 = vsel %vm1187_vm6, %v1186_v37, %v1180_v20  ;;  %v1188_v44 = vsel %vm1187_vm6, %v1184_v38, %v1186_v37  ;;  %v1189_v45 = vsel %vm1187_vm6, %v1182_v18, %v1184_v38  ;;  %v3778_v38 = vrot.slane %v3280_v35, %v3492_v13 }
  0xb8   :  { %v1216_v46 = vmul.f32 %v3707_v25, %v1191_v39  ;;  %v1214_v47 = vmul.f32 %v3711_v26, %v1189_v45  ;;  %v1215_v48 = vmul.f32 %v3714_v30, %v1188_v44  ;;  %v3781_v39 = vrot.slane %v3280_v35, %v3494_v14 }
  0xb9   :  { %4101 = vst [vmem:[#allocation14_spill] sm:$0xff] %v3778_v38  ;;  %v3784_v44 = vrot.slane %v3280_v35, %v3498_v16  ;;  %v3787_v45 = vrot.slane %v3280_v35, %v3496_v15 }
  0xba   :  { %v1371_v51 = vpop.permute.xlu1 %1370  ;;  %1323 = vmatprep.subr.mxu1 %v1216_v46  ;;  %v1369_v54 = vpop.permute.xlu0 %1368  ;;  %1252 = vmatprep.subr.mxu0 %v1214_v47  ;;  %4102 = vst [vmem:[#allocation15_spill] sm:$0xff] %v3781_v39 }
  0xbb   :  { %1253 = vmatpush1.msra.mxu0 %v1213_v49  ;;  %1324 = vmatpush1.msra.mxu1 %v1215_v48  ;;  %v1379_v62 = vsel %vm1376_vm7, %v1369_v54, %v1371_v51  ;;  %4103 = vst [vmem:[#allocation16_spill] sm:$0xff] %v3784_v44  ;;  %4104 = vst [vmem:[#allocation17_spill] sm:$0xff] %v3787_v45 }
  0xbc   :  { %3299 = vmatmul.mubr.msk.f32.vlgmr.msra.gmra.mxu0 %vm145_vm2, %v3298_v50  ;;  %3300 = vmatmul.mubr.msk.f32.vlgmr.msra.gmra.mxu1 %vm145_vm2, %v3298_v50  ;;  %v1402_v18 = vmul.f32 %v3752_v59, %v1379_v62 }
  0xbd   :  { %1475 = vmatprep.mubr.f32.mxu0 %v4077_v9  ;;  %1546 = vmatprep.mubr.f32.mxu1 %v4077_v9 }
  0xbe   :  { %v1375_v63 = vpop.permute.xlu1 %1374  ;;  %v1373_v0 = vpop.permute.xlu0 %1372 }
  0xbf   :  { %v1380_v1 = vsel %vm1376_vm7, %v1375_v63, %v1369_v54  ;;  %v1377_v2 = vsel %vm1376_vm7, %v1373_v0, %v1375_v63  ;;  %v1378_v3 = vsel %vm1376_vm7, %v1371_v51, %v1373_v0 }
  0xc0   :  { %v1405_v4 = vmul.f32 %v3743_v8, %v1380_v1  ;;  %v1403_v10 = vmul.f32 %v3746_v7, %v1378_v3  ;;  %v1404_v11 = vmul.f32 %v3749_v5, %v1377_v2 }
  0xc2   :  { %v1560_v20 = vpop.permute.xlu1 %1559  ;;  %1512 = vmatprep.subr.mxu1 %v1405_v4  ;;  %v1558_v37 = vpop.permute.xlu0 %1557  ;;  %1441 = vmatprep.subr.mxu0 %v1403_v10 }
  0xc3   :  { %1442 = vmatpush1.msra.mxu0 %v1402_v18  ;;  %1513 = vmatpush1.msra.mxu1 %v1404_v11  ;;  %v1568_v46 = vsel %vm1565_vm8, %v1558_v37, %v1560_v20 }
  0xc4   :  { %3302 = vmatmul.mubr.msk.f32.vlgmr.msra.gmra.mxu0 %vm145_vm2, %v3301_v19  ;;  %3303 = vmatmul.mubr.msk.f32.vlgmr.msra.gmra.mxu1 %vm145_vm2, %v3301_v19  ;;  %v1591_v51 = vmul.f32 %v3787_v45, %v1568_v46 }
  0xc5   :  { %1664 = vmatprep.mubr.f32.mxu0 %v4077_v9  ;;  %1735 = vmatprep.mubr.f32.mxu1 %v4077_v9 }
  0xc6   :  { %v1564_v47 = vpop.permute.xlu1 %1563  ;;  %v1562_v48 = vpop.permute.xlu0 %1561 }
  0xc7   :  { %v1569_v13 = vsel %vm1565_vm8, %v1564_v47, %v1558_v37  ;;  %v1566_v14 = vsel %vm1565_vm8, %v1562_v48, %v1564_v47  ;;  %v1567_v16 = vsel %vm1565_vm8, %v1560_v20, %v1562_v48 }
  0xc8   :  { %v1594_v15 = vmul.f32 %v3778_v38, %v1569_v13  ;;  %v1592_v49 = vmul.f32 %v3781_v39, %v1567_v16  ;;  %v1593_v50 = vmul.f32 %v3784_v44, %v1566_v14 }
  0xca   :  { %1630 = vmatprep.subr.mxu0 %v1592_v49  ;;  %1701 = vmatprep.subr.mxu1 %v1594_v15 }
  0xcb   :  { %1631 = vmatpush1.msra.mxu0 %v1591_v51  ;;  %1702 = vmatpush1.msra.mxu1 %v1593_v50 }
  0xcc   :  { %3305 = vmatmul.mubr.msk.f32.vlgmr.msra.gmra.mxu0 %vm145_vm2, %v3304_v52  ;;  %3306 = vmatmul.mubr.msk.f32.vlgmr.msra.gmra.mxu1 %vm145_vm2, %v3304_v52 }
  0xcd   :  { %1862 = vmatprep.mubr.f32.mxu0 %v4077_v9  ;;  %1933 = vmatprep.mubr.f32.mxu1 %v4077_v9 }
 0x154   :  { %v215_v54 = vpop.f32.mrf.mxu0  ;;  %v286_v62 = vpop.f32.mrf.mxu1 }
 0x156   :  { %v217_v63 = vpop.f32.mrf.mxu0  ;;  %v288_v0 = vpop.f32.mrf.mxu1 }
 0x15b   :  { %v360_v1 = vpop.f32.mrf.mxu0 }
 0x15c   :  { %v431_v2 = vpop.f32.mrf.mxu1  ;;  %v361_v16 = vadd.f32 %v360_v1, %v215_v54 }
 0x15d   :  { %v362_v3 = vpop.f32.mrf.mxu0  ;;  %v432_v15 = vadd.f32 %v431_v2, %v286_v62 }
 0x15e   :  { %v433_v4 = vpop.f32.mrf.mxu1  ;;  %v363_v52 = vadd.f32 %v362_v3, %v217_v63 }
 0x15f   :  { %v434_v49 = vadd.f32 %v433_v4, %v288_v0 }
 0x163   :  { %v545_v10 = vpop.f32.mrf.mxu0 }
 0x164   :  { %v616_v11 = vpop.f32.mrf.mxu1  ;;  %v621_v9 = vadd.f32 %v545_v10, %v361_v16 }
 0x165   :  { %v547_v18 = vpop.f32.mrf.mxu0  ;;  %v623_v38 = vadd.f32 %v616_v11, %v432_v15 }
 0x166   :  { %v618_v19 = vpop.f32.mrf.mxu1  ;;  %v622_v8 = vadd.f32 %v547_v18, %v363_v52 }
 0x167   :  { %v624_v44 = vadd.f32 %v618_v19, %v434_v49 }
 0x16b   :  { %v734_v20 = vpop.f32.mrf.mxu0 }
 0x16c   :  { %v805_v35 = vpop.f32.mrf.mxu1  ;;  %v810_v5 = vadd.f32 %v734_v20, %v621_v9 }
 0x16d   :  { %v736_v37 = vpop.f32.mrf.mxu0  ;;  %v812_v59 = vadd.f32 %v805_v35, %v623_v38  ;;  %v1746_v35 = vstv %s3269_s2 }
 0x16e   :  { %v807_v46 = vpop.f32.mrf.mxu1  ;;  %v811_v34 = vadd.f32 %v736_v37, %v622_v8 }
 0x16f   :  { %v910_v47 = vpop.f32.mrf.mxu0  ;;  %v813_v30 = vadd.f32 %v807_v46, %v624_v44 }
 0x170   :  { %v981_v48 = vpop.f32.mrf.mxu1  ;;  %v986_v26 = vadd.f32 %v910_v47, %v810_v5 }
 0x171   :  { %v912_v13 = vpop.f32.mrf.mxu0  ;;  %v988_v6 = vadd.f32 %v981_v48, %v812_v59 }
 0x172   :  { %v983_v14 = vpop.f32.mrf.mxu1  ;;  %v987_v2 = vadd.f32 %v912_v13, %v811_v34 }
 0x173   :  { %v989_v0 = vadd.f32 %v983_v14, %v813_v30 }
 0x174   :  { %v1099_v50 = vpop.f32.mrf.mxu0  ;;  %v1170_v51 = vpop.f32.mrf.mxu1 }
 0x175   :  { %v1175_v3 = vadd.f32 %v1099_v50, %v986_v26  ;;  %v1177_v4 = vadd.f32 %v1170_v51, %v988_v6 }
 0x176   :  { %v1101_v45 = vpop.f32.mrf.mxu0  ;;  %v1172_v39 = vpop.f32.mrf.mxu1 }
 0x177   :  { %v1176_v10 = vadd.f32 %v1101_v45, %v987_v2  ;;  %v1178_v11 = vadd.f32 %v1172_v39, %v989_v0 }
 0x17c   :  { %v1288_v7 = vpop.f32.mrf.mxu0  ;;  %v1359_v25 = vpop.f32.mrf.mxu1 }
 0x17d   :  { %v1364_v9 = vadd.f32 %v1288_v7, %v1175_v3  ;;  %v1366_v38 = vadd.f32 %v1359_v25, %v1177_v4  ;;  %v1755_v25 = vstv %s3270_s30 }
 0x17e   :  { %v1290_v54 = vpop.f32.mrf.mxu0  ;;  %v1361_v62 = vpop.f32.mrf.mxu1 }
 0x17f   :  { %v1365_v44 = vadd.f32 %v1290_v54, %v1176_v10  ;;  %v1367_v8 = vadd.f32 %v1361_v62, %v1178_v11 }
 0x184   :  { %v1477_v1 = vpop.f32.mrf.mxu0  ;;  %v1548_v63 = vpop.f32.mrf.mxu1 }
 0x185   :  { %v1553_v5 = vadd.f32 %v1477_v1, %v1364_v9  ;;  %v1555_v59 = vadd.f32 %v1548_v63, %v1366_v38 }
 0x186   :  { %v1479_v18 = vpop.f32.mrf.mxu0  ;;  %v1550_v19 = vpop.f32.mrf.mxu1 }
 0x187   :  { %v1554_v30 = vadd.f32 %v1479_v18, %v1365_v44  ;;  %v1556_v46 = vadd.f32 %v1550_v19, %v1367_v8 }
 0x18c   :  { %v1666_v20 = vpop.f32.mrf.mxu0  ;;  %v1737_v37 = vpop.f32.mrf.mxu1 }
 0x18d   :  { %v1742_v47 = vadd.f32 %v1666_v20, %v1553_v5  ;;  %v1744_v34 = vadd.f32 %v1737_v37, %v1555_v59 }
 0x18e   :  { %v1668_v26 = vpop.f32.mrf.mxu0  ;;  %v1739_v6 = vpop.f32.mrf.mxu1 }
 0x18f   :  { %v1747_v48 = vadd.f32 %v1746_v35, %v1742_v47  ;;  %v1749_v45 = vadd.f32 %v1746_v35, %v1744_v34  ;;  %v1743_v39 = vadd.f32 %v1668_v26, %v1554_v30  ;;  %v1745_v7 = vadd.f32 %v1739_v6, %v1556_v46  ;;  %v1776_v47 = vld [vmem:[%s4074_s3] sm:$0xff] }
 0x191   :  { %v1751_v13 = vmax.f32 %v1747_v48, 0.0  ;;  %v1748_v14 = vadd.f32 %v1746_v35, %v1743_v39  ;;  %v1750_v16 = vadd.f32 %v1746_v35, %v1745_v7  ;;  %v1753_v49 = vmax.f32 %v1749_v45, 0.0 }
 0x193   :  { %v3810_v15 = vadd.f32 %v1755_v25, %v1751_v13  ;;  %v1752_v50 = vmax.f32 %v1748_v14, 0.0  ;;  %v1754_v52 = vmax.f32 %v1750_v16, 0.0  ;;  %v3816_v54 = vadd.f32 %v1755_v25, %v1753_v49  ;;  %v3312_v13 = vld [vmem:[%s4074_s3 + $0x10] sm:$0xff] }
 0x195   :  { %v3812_v51 = vadd.f32 %v1755_v25, %v1752_v50  ;;  %1777 = vrot.lane.b32.xlu0 %v3810_v15, %s3362_s6  ;;  %v3820_v62 = vadd.f32 %v1755_v25, %v1754_v52 }
 0x197   :  { %1779 = vrot.lane.b32.xlu1 %v3812_v51, %s3362_s6 }
 0x199   :  { %1781 = vrot.lane.b32.xlu0 %v3816_v54, %s3362_s6 }
 0x19b   :  { %1783 = vrot.lane.b32.xlu1 %v3820_v62, %s3362_s6 }
 0x19d   :  { %1760 = vrot.lane.b32.xlu0 %v3810_v15, %s3364_s7 }
 0x19f   :  { %1762 = vrot.lane.b32.xlu1 %v3812_v51, %s3364_s7 }
 0x1a1   :  { %1764 = vrot.lane.b32.xlu0 %v3816_v54, %s3364_s7 }
 0x1a3   :  { %1766 = vrot.lane.b32.xlu1 %v3820_v62, %s3364_s7 }
 0x1a5   :  { %2085 = vrot.lane.b32.xlu0 %v3810_v15, %s3365_s8 }
 0x1a7   :  { %2087 = vrot.lane.b32.xlu1 %v3812_v51, %s3365_s8 }
 0x1a9   :  { %2089 = vrot.lane.b32.xlu0 %v3816_v54, %s3365_s8 }
 0x1ab   :  { %2091 = vrot.lane.b32.xlu1 %v3820_v62, %s3365_s8 }
 0x1ad   :  { %2252 = vrot.lane.b32.xlu0 %v3810_v15, %s3366_s9 }
 0x1af   :  { %2254 = vrot.lane.b32.xlu1 %v3812_v51, %s3366_s9 }
 0x1b1   :  { %2256 = vrot.lane.b32.xlu0 %v3816_v54, %s3366_s9 }
 0x1b3   :  { %2258 = vrot.lane.b32.xlu1 %v3820_v62, %s3366_s9 }
 0x1b5   :  { %2574 = vrot.lane.b32.xlu0 %v3810_v15, %s3367_s10 }
 0x1b7   :  { %2576 = vrot.lane.b32.xlu1 %v3812_v51, %s3367_s10 }
 0x1b9   :  { %2578 = vrot.lane.b32.xlu0 %v3816_v54, %s3367_s10 }
 0x1bb   :  { %2580 = vrot.lane.b32.xlu1 %v3820_v62, %s3367_s10 }
 0x1bd   :  { %2741 = vrot.lane.b32.xlu0 %v3810_v15, %s3368_s11 }
 0x1bf   :  { %2743 = vrot.lane.b32.xlu1 %v3812_v51, %s3368_s11 }
 0x1c1   :  { %2745 = vrot.lane.b32.xlu0 %v3816_v54, %s3368_s11 }
 0x1c3   :  { %2747 = vrot.lane.b32.xlu1 %v3820_v62, %s3368_s11 }
 0x1c5   :  { %2908 = vrot.lane.b32.xlu0 %v3810_v15, %s3369_s12 }
 0x1c7   :  { %2910 = vrot.lane.b32.xlu1 %v3812_v51, %s3369_s12 }
 0x1c9   :  { %2912 = vrot.lane.b32.xlu0 %v3816_v54, %s3369_s12 }
 0x1cb   :  { %2914 = vrot.lane.b32.xlu1 %v3820_v62, %s3369_s12 }
 0x1cd   :  { %3075 = vrot.lane.b32.xlu0 %v3810_v15, %s3370_s13 }
 0x1cf   :  { %3077 = vrot.lane.b32.xlu1 %v3812_v51, %s3370_s13 }
 0x1d1   :  { %3079 = vrot.lane.b32.xlu0 %v3816_v54, %s3370_s13 }
 0x1d3   :  { %3081 = vrot.lane.b32.xlu1 %v3820_v62, %s3370_s13 }
 0x207   :  { %v1778_v0 = vpop.permute.xlu0 %1777 }
 0x209   :  { %v1780_v1 = vpop.permute.xlu1 %1779 }
 0x20a   :  { %v1787_v63 = vsel %vm113_vm0, %v1778_v0, %v1780_v1 }
 0x20b   :  { %v1790_v2 = vmul.f32 %v1787_v63, %v3511_v22  ;;  %v1782_v3 = vpop.permute.xlu0 %1781  ;;  %v3307_v22 = vld [vmem:[%s4074_s3 + $0x8] sm:$0xff] }
 0x20c   :  { %v1786_v4 = vsel %vm113_vm0, %v1780_v1, %v1782_v3 }
 0x20d   :  { %1828 = vmatprep.subr.mxu0 %v1790_v2  ;;  %v1784_v10 = vpop.permute.xlu1 %1783  ;;  %v1791_v44 = vmul.f32 %v1786_v4, %v3517_v24  ;;  %v3315_v4 = vld [vmem:[%s4074_s3 + $0x18] sm:$0xff] }
 0x20e   :  { %v1785_v11 = vsel %vm113_vm0, %v1782_v3, %v1784_v10  ;;  %v1788_v9 = vsel %vm113_vm0, %v1784_v10, %v1778_v0  ;;  %v2420_v3 = vmul.f32 %v3812_v51, %v3627_v32  ;;  %v2421_v32 = vmul.f32 %v3816_v54, %v3643_v41 }
 0x20f   :  { %v1789_v38 = vmul.f32 %v1788_v9, %v3514_v23  ;;  %v1792_v18 = vmul.f32 %v1785_v11, %v3508_v21  ;;  %v1761_v19 = vpop.permute.xlu0 %1760  ;;  %v4105_v21 = vmov 0.0   ;;  %v2422_v11 = vmul.f32 %v3820_v62, %v3634_v36 }
 0x211   :  { %1829 = vmatpush1.msra.mxu0 %v1789_v38  ;;  %1899 = vmatprep.subr.mxu1 %v1792_v18  ;;  %v1763_v8 = vpop.permute.xlu1 %1762  ;;  %v4106_v38 = vld [vmem:[#allocation5_spill] sm:$0xff] }
 0x212   :  { %v1770_v5 = vsel %vm74_vm1, %v1761_v19, %v1763_v8  ;;  %1900 = vmatpush1.msra.mxu1 %v1791_v44  ;;  %3308 = vmatmul.mubr.msk.f32.vlgmr.msra.gmra.mxu0 %vm145_vm2, %v3307_v22 }
 0x213   :  { %v1773_v23 = vmul.f32 %v1770_v5, %v3521_v27  ;;  %v1765_v59 = vpop.permute.xlu0 %1764  ;;  %3309 = vmatmul.mubr.msk.f32.vlgmr.msra.gmra.mxu1 %vm145_vm2, %v3307_v22  ;;  %2007 = vmatprep.mubr.f32.mxu0 %v4105_v21 }
 0x214   :  { %2078 = vmatprep.mubr.f32.mxu1 %v4105_v21  ;;  %v1769_v24 = vsel %vm74_vm1, %v1763_v8, %v1765_v59  ;;  %v4107_v8 = vld [vmem:[#allocation7_spill] sm:$0xff] }
 0x215   :  { %1973 = vmatprep.subr.mxu0 %v1773_v23  ;;  %v1767_v20 = vpop.permute.xlu1 %1766  ;;  %v1774_v34 = vmul.f32 %v1769_v24, %v3545_v42 }
 0x216   :  { %v1768_v35 = vsel %vm74_vm1, %v1765_v59, %v1767_v20  ;;  %v1771_v37 = vsel %vm74_vm1, %v1767_v20, %v1761_v19  ;;  %v4108_v59 = vld [vmem:[#allocation9_spill] sm:$0xff] }
 0x217   :  { %v1772_v27 = vmul.f32 %v1771_v37, %v3541_v40  ;;  %v1775_v30 = vmul.f32 %v1768_v35, %v3548_v43  ;;  %v2086_v46 = vpop.permute.xlu0 %2085  ;;  %v3324_v37 = vld [vmem:[%s4074_s3 + $0x30] sm:$0xff] }
 0x219   :  { %1974 = vmatpush1.msra.mxu0 %v1772_v27  ;;  %2044 = vmatprep.subr.mxu1 %v1775_v30  ;;  %v2088_v26 = vpop.permute.xlu1 %2087  ;;  %v4109_v27 = vld [vmem:[#allocation8_spill] sm:$0xff] }
 0x21a   :  { %v2095_v6 = vsel %vm444_vm3, %v2086_v46, %v2088_v26  ;;  %2045 = vmatpush1.msra.mxu1 %v1774_v34  ;;  %3310 = vmatmul.mubr.msk.f32.vlgmr.msra.gmra.mxu0 %vm145_vm2, %v1776_v47 }
 0x21b   :  { %v2098_v40 = vmul.f32 %v2095_v6, %v3568_v53  ;;  %v2090_v48 = vpop.permute.xlu0 %2089  ;;  %3311 = vmatmul.mubr.msk.f32.vlgmr.msra.gmra.mxu1 %vm145_vm2, %v1776_v47  ;;  %2170 = vmatprep.mubr.f32.mxu0 %v4105_v21 }
 0x21c   :  { %2241 = vmatprep.mubr.f32.mxu1 %v4105_v21  ;;  %v2094_v42 = vsel %vm444_vm3, %v2088_v26, %v2090_v48 }
 0x21d   :  { %2136 = vmatprep.subr.mxu0 %v2098_v40  ;;  %v2092_v43 = vpop.permute.xlu1 %2091  ;;  %v2099_v14 = vmul.f32 %v2094_v42, %v3581_v60  ;;  %v4111_v42 = vld [vmem:[#allocation11_spill] sm:$0xff] }
 0x21e   :  { %v2093_v45 = vsel %vm444_vm3, %v2090_v48, %v2092_v43  ;;  %v2096_v39 = vsel %vm444_vm3, %v2092_v43, %v2086_v46  ;;  %v4110_v46 = vld [vmem:[#allocation6_spill] sm:$0xff] }
 0x21f   :  { %v2097_v53 = vmul.f32 %v2096_v39, %v3576_v58  ;;  %v2100_v7 = vmul.f32 %v2093_v45, %v3584_v61  ;;  %v2253_v25 = vpop.permute.xlu0 %2252  ;;  %v4112_v39 = vld [vmem:[#allocation13_spill] sm:$0xff] }
 0x221   :  { %2137 = vmatpush1.msra.mxu0 %v2097_v53  ;;  %2207 = vmatprep.subr.mxu1 %v2100_v7  ;;  %v2255_v16 = vpop.permute.xlu1 %2254 }
 0x222   :  { %v2262_v49 = vsel %vm633_vm4, %v2253_v25, %v2255_v16  ;;  %2208 = vmatpush1.msra.mxu1 %v2099_v14  ;;  %3313 = vmatmul.mubr.msk.f32.vlgmr.msra.gmra.mxu0 %vm145_vm2, %v3312_v13  ;;  %v4113_v14 = vld [vmem:[#allocation12_spill] sm:$0xff] }
 0x223   :  { %v2265_v58 = vmul.f32 %v2262_v49, %v3603_v17  ;;  %v2257_v50 = vpop.permute.xlu0 %2256  ;;  %3314 = vmatmul.mubr.msk.f32.vlgmr.msra.gmra.mxu1 %vm145_vm2, %v3312_v13  ;;  %2337 = vmatprep.mubr.f32.mxu0 %v4105_v21  ;;  %v3327_v13 = vld [vmem:[%s4074_s3 + $0x38] sm:$0xff]  ;;  %v4114_v49 = vld [vmem:[#allocation10_spill] sm:$0xff] }
 0x224   :  { %2408 = vmatprep.mubr.f32.mxu1 %v4105_v21  ;;  %v2261_v60 = vsel %vm633_vm4, %v2255_v16, %v2257_v50 }
 0x225   :  { %2303 = vmatprep.subr.mxu0 %v2265_v58  ;;  %v2259_v61 = vpop.permute.xlu1 %2258  ;;  %v2266_v2 = vmul.f32 %v2261_v60, %v3617_v29 }
 0x226   :  { %v2260_v52 = vsel %vm633_vm4, %v2257_v50, %v2259_v61  ;;  %v2263_v0 = vsel %vm633_vm4, %v2259_v61, %v2253_v25 }
 0x227   :  { %v2264_v17 = vmul.f32 %v2263_v0, %v3614_v28  ;;  %v2267_v1 = vmul.f32 %v2260_v52, %v3622_v31  ;;  %v2575_v63 = vpop.permute.xlu0 %2574  ;;  %v2419_v28 = vmul.f32 %v3810_v15, %v3631_v33  ;;  %v3318_v33 = vld [vmem:[%s4074_s3 + $0x20] sm:$0xff] }
 0x229   :  { %2304 = vmatpush1.msra.mxu0 %v2264_v17  ;;  %2374 = vmatprep.subr.mxu1 %v2267_v1  ;;  %v2577_v10 = vpop.permute.xlu1 %2576  ;;  %v4115_v17 = vld [vmem:[#allocation15_spill] sm:$0xff] }
 0x22a   :  { %2375 = vmatpush1.msra.mxu1 %v2266_v2  ;;  %2458 = vmatprep.subr.mxu0 %v2420_v3  ;;  %v2584_v29 = vsel %vm998_vm5, %v2575_v63, %v2577_v10  ;;  %v4116_v2 = vld [vmem:[#allocation17_spill] sm:$0xff] }
 0x22b   :  { %v2579_v31 = vpop.permute.xlu0 %2578  ;;  %3316 = vmatmul.mubr.msk.f32.vlgmr.msra.gmra.mxu0 %vm145_vm2, %v3315_v4  ;;  %2529 = vmatprep.subr.mxu1 %v2422_v11  ;;  %v2586_v62 = vmul.f32 %v2584_v29, %v3678_v57  ;;  %v3330_v11 = vld [vmem:[%s4074_s3 + $0x40] sm:$0xff] }
 0x22c   :  { %v2583_v51 = vsel %vm998_vm5, %v2577_v10, %v2579_v31  ;;  %2459 = vmatpush1.msra.mxu0 %v2419_v28  ;;  %3317 = vmatmul.mubr.msk.f32.vlgmr.msra.gmra.mxu1 %vm145_vm2, %v3315_v4  ;;  %v4117_v28 = vld [vmem:[#allocation16_spill] sm:$0xff] }
 0x22d   :  { %v2587_v36 = vmul.f32 %v2583_v51, %v3669_v55  ;;  %2530 = vmatpush1.msra.mxu1 %v2421_v32  ;;  %v2581_v15 = vpop.permute.xlu1 %2580  ;;  %2492 = vmatprep.mubr.f32.mxu0 %v4105_v21  ;;  %v3321_v55 = vld [vmem:[%s4074_s3 + $0x28] sm:$0xff]  ;;  %s3271_s3 = sld [smem:[#allocation2 + $0x3]] }
 0x22e   :  { %v2582_v41 = vsel %vm998_vm5, %v2579_v31, %v2581_v15  ;;  %v2585_v54 = vsel %vm998_vm5, %v2581_v15, %v2575_v63  ;;  %2563 = vmatprep.mubr.f32.mxu1 %v4105_v21  ;;  %v4118_v31 = vld [vmem:[#allocation14_spill] sm:$0xff] }
 0x22f   :  { %v2588_v9 = vmul.f32 %v2582_v41, %v3672_v56  ;;  %v2589_v18 = vmul.f32 %v2585_v54, %v4106_v38  ;;  %v2742_v19 = vpop.permute.xlu0 %2741  ;;  %2625 = vmatprep.subr.mxu0 %v2587_v36  ;;  %3319 = vmatmul.mubr.msk.f32.vlgmr.msra.gmra.mxu0 %vm145_vm2, %v3318_v33 }
 0x230   :  { %3320 = vmatmul.mubr.msk.f32.vlgmr.msra.gmra.mxu1 %vm145_vm2, %v3318_v33  ;;  %2626 = vmatpush1.msra.mxu0 %v2586_v62 }
 0x231   :  { %2696 = vmatprep.subr.mxu1 %v2589_v18  ;;  %v2744_v57 = vpop.permute.xlu1 %2743  ;;  %2659 = vmatprep.mubr.f32.mxu0 %v4105_v21 }
 0x232   :  { %2697 = vmatpush1.msra.mxu1 %v2588_v9  ;;  %2730 = vmatprep.mubr.f32.mxu1 %v4105_v21  ;;  %v2751_v56 = vsel %vm1187_vm6, %v2742_v19, %v2744_v57 }
 0x233   :  { %v2746_v22 = vpop.permute.xlu0 %2745  ;;  %3322 = vmatmul.mubr.msk.f32.vlgmr.msra.gmra.mxu0 %vm145_vm2, %v3321_v55  ;;  %v2753_v24 = vmul.f32 %v2751_v56, %v4108_v59 }
 0x234   :  { %v2750_v44 = vsel %vm1187_vm6, %v2744_v57, %v2746_v22  ;;  %3323 = vmatmul.mubr.msk.f32.vlgmr.msra.gmra.mxu1 %vm145_vm2, %v3321_v55  ;;  %2826 = vmatprep.mubr.f32.mxu0 %v4105_v21 }
 0x235   :  { %v2754_v5 = vmul.f32 %v2750_v44, %v4107_v8  ;;  %v2748_v23 = vpop.permute.xlu1 %2747  ;;  %2897 = vmatprep.mubr.f32.mxu1 %v4105_v21 }
 0x236   :  { %v2749_v20 = vsel %vm1187_vm6, %v2746_v22, %v2748_v23  ;;  %v2752_v35 = vsel %vm1187_vm6, %v2748_v23, %v2742_v19 }
 0x237   :  { %v2755_v30 = vmul.f32 %v2749_v20, %v4109_v27  ;;  %v2756_v47 = vmul.f32 %v2752_v35, %v4110_v46  ;;  %v2909_v34 = vpop.permute.xlu0 %2908  ;;  %2792 = vmatprep.subr.mxu0 %v2754_v5 }
 0x238   :  { %2793 = vmatpush1.msra.mxu0 %v2753_v24 }
 0x239   :  { %2863 = vmatprep.subr.mxu1 %v2756_v47  ;;  %v2911_v26 = vpop.permute.xlu1 %2910  ;;  %3325 = vmatmul.mubr.msk.f32.vlgmr.msra.gmra.mxu0 %vm145_vm2, %v3324_v37 }
 0x23a   :  { %2864 = vmatpush1.msra.mxu1 %v2755_v30  ;;  %2993 = vmatprep.mubr.f32.mxu0 %v4105_v21  ;;  %v2918_v6 = vsel %vm1376_vm7, %v2909_v34, %v2911_v26 }
 0x23b   :  { %v2913_v40 = vpop.permute.xlu0 %2912  ;;  %3326 = vmatmul.mubr.msk.f32.vlgmr.msra.gmra.mxu1 %vm145_vm2, %v3324_v37  ;;  %v2920_v53 = vmul.f32 %v2918_v6, %v4112_v39 }
 0x23c   :  { %v2917_v48 = vsel %vm1376_vm7, %v2911_v26, %v2913_v40  ;;  %3064 = vmatprep.mubr.f32.mxu1 %v4105_v21 }
 0x23d   :  { %v2921_v43 = vmul.f32 %v2917_v48, %v4111_v42  ;;  %v2915_v45 = vpop.permute.xlu1 %2914 }
 0x23e   :  { %v2916_v7 = vsel %vm1376_vm7, %v2913_v40, %v2915_v45  ;;  %v2919_v25 = vsel %vm1376_vm7, %v2915_v45, %v2909_v34 }
 0x23f   :  { %v2922_v16 = vmul.f32 %v2916_v7, %v4113_v14  ;;  %v2923_v58 = vmul.f32 %v2919_v25, %v4114_v49  ;;  %v3076_v50 = vpop.permute.xlu0 %3075  ;;  %2959 = vmatprep.subr.mxu0 %v2921_v43 }
 0x240   :  { %2960 = vmatpush1.msra.mxu0 %v2920_v53 }
 0x241   :  { %3030 = vmatprep.subr.mxu1 %v2923_v58  ;;  %v3078_v60 = vpop.permute.xlu1 %3077  ;;  %3328 = vmatmul.mubr.msk.f32.vlgmr.msra.gmra.mxu0 %vm145_vm2, %v3327_v13 }
 0x242   :  { %3031 = vmatpush1.msra.mxu1 %v2922_v16  ;;  %3160 = vmatprep.mubr.f32.mxu0 %v4105_v21  ;;  %v3085_v61 = vsel %vm1565_vm8, %v3076_v50, %v3078_v60 }
 0x243   :  { %v3080_v52 = vpop.permute.xlu0 %3079  ;;  %3329 = vmatmul.mubr.msk.f32.vlgmr.msra.gmra.mxu1 %vm145_vm2, %v3327_v13  ;;  %v3087_v3 = vmul.f32 %v3085_v61, %v4116_v2 }
 0x244   :  { %v3084_v0 = vsel %vm1565_vm8, %v3078_v60, %v3080_v52  ;;  %3231 = vmatprep.mubr.f32.mxu1 %v4105_v21 }
 0x245   :  { %v3088_v1 = vmul.f32 %v3084_v0, %v4115_v17  ;;  %v3082_v63 = vpop.permute.xlu1 %3081 }
 0x246   :  { %v3083_v4 = vsel %vm1565_vm8, %v3080_v52, %v3082_v63  ;;  %v3086_v10 = vsel %vm1565_vm8, %v3082_v63, %v3076_v50 }
 0x247   :  { %v3089_v29 = vmul.f32 %v3083_v4, %v4117_v28  ;;  %v3090_v32 = vmul.f32 %v3086_v10, %v4118_v31  ;;  %3126 = vmatprep.subr.mxu0 %v3088_v1  ;;  %v3242_v4 = vstv %s3271_s3  ;;  %v3247_v31 = vstv %s3272_s24 }
 0x248   :  { %3127 = vmatpush1.msra.mxu0 %v3087_v3 }
 0x249   :  { %3331 = vmatmul.mubr.msk.f32.vlgmr.msra.gmra.mxu0 %vm145_vm2, %v3330_v11  ;;  %3197 = vmatprep.subr.mxu1 %v3090_v32 }
 0x24a   :  { %3198 = vmatpush1.msra.mxu1 %v3089_v29 }
 0x24b   :  { %3332 = vmatmul.mubr.msk.f32.vlgmr.msra.gmra.mxu1 %vm145_vm2, %v3330_v11 }
 0x2d2   :  { %v1864_v21 = vpop.f32.mrf.mxu0 }
 0x2d3   :  { %v1935_v51 = vpop.f32.mrf.mxu1 }
 0x2d4   :  { %v1866_v12 = vpop.f32.mrf.mxu0 }
 0x2d5   :  { %v1937_v33 = vpop.f32.mrf.mxu1 }
 0x2da   :  { %v2009_v36 = vpop.f32.mrf.mxu0 }
 0x2db   :  { %v2080_v15 = vpop.f32.mrf.mxu1  ;;  %v2010_v5 = vadd.f32 %v2009_v36, %v1864_v21 }
 0x2dc   :  { %v2011_v62 = vpop.f32.mrf.mxu0  ;;  %v2081_v59 = vadd.f32 %v2080_v15, %v1935_v51 }
 0x2dd   :  { %v2082_v41 = vpop.f32.mrf.mxu1  ;;  %v2012_v24 = vadd.f32 %v2011_v62, %v1866_v12 }
 0x2de   :  { %v2083_v27 = vadd.f32 %v2082_v41, %v1937_v33 }
 0x2e2   :  { %v2172_v54 = vpop.f32.mrf.mxu0 }
 0x2e3   :  { %v2243_v9 = vpop.f32.mrf.mxu1  ;;  %v2248_v35 = vadd.f32 %v2172_v54, %v2010_v5 }
 0x2e4   :  { %v2174_v38 = vpop.f32.mrf.mxu0  ;;  %v2250_v30 = vadd.f32 %v2243_v9, %v2081_v59 }
 0x2e5   :  { %v2245_v18 = vpop.f32.mrf.mxu1  ;;  %v2249_v46 = vadd.f32 %v2174_v38, %v2012_v24  ;;  %v3343_v38 = vld [vmem:[%s4072_s1] sm:$0xff] }
 0x2e6   :  { %v2251_v40 = vadd.f32 %v2245_v18, %v2083_v27 }
 0x2eb   :  { %v2339_v19 = vpop.f32.mrf.mxu0 }
 0x2ec   :  { %v2410_v55 = vpop.f32.mrf.mxu1  ;;  %v2415_v34 = vadd.f32 %v2339_v19, %v2248_v35 }
 0x2ed   :  { %v2341_v57 = vpop.f32.mrf.mxu0  ;;  %v2417_v48 = vadd.f32 %v2410_v55, %v2250_v30 }
 0x2ee   :  { %v2412_v56 = vpop.f32.mrf.mxu1  ;;  %v2416_v42 = vadd.f32 %v2341_v57, %v2249_v46 }
 0x2ef   :  { %v2494_v22 = vpop.f32.mrf.mxu0  ;;  %v2418_v53 = vadd.f32 %v2412_v56, %v2251_v40 }
 0x2f0   :  { %v2565_v44 = vpop.f32.mrf.mxu1  ;;  %v2570_v45 = vadd.f32 %v2494_v22, %v2415_v34  ;;  %v3344_v22 = vld [vmem:[%s4072_s1 + $0x8] sm:$0xff] }
 0x2f1   :  { %v2496_v8 = vpop.f32.mrf.mxu0  ;;  %v2572_v7 = vadd.f32 %v2565_v44, %v2417_v48 }
 0x2f2   :  { %v2567_v23 = vpop.f32.mrf.mxu1  ;;  %v2571_v25 = vadd.f32 %v2496_v8, %v2416_v42  ;;  %v3345_v8 = vld [vmem:[%s4072_s1 + $0x10] sm:$0xff] }
 0x2f3   :  { %v2661_v20 = vpop.f32.mrf.mxu0  ;;  %v2573_v58 = vadd.f32 %v2567_v23, %v2418_v53 }
 0x2f4   :  { %v2732_v37 = vpop.f32.mrf.mxu1  ;;  %v2737_v16 = vadd.f32 %v2661_v20, %v2570_v45  ;;  %v3346_v20 = vld [vmem:[%s4072_s1 + $0x18] sm:$0xff] }
 0x2f5   :  { %v2663_v47 = vpop.f32.mrf.mxu0  ;;  %v2739_v50 = vadd.f32 %v2732_v37, %v2572_v7 }
 0x2f6   :  { %v2734_v26 = vpop.f32.mrf.mxu1  ;;  %v2738_v60 = vadd.f32 %v2663_v47, %v2571_v25 }
 0x2f7   :  { %v2740_v0 = vadd.f32 %v2734_v26, %v2573_v58 }
 0x2f9   :  { %v2828_v6 = vpop.f32.mrf.mxu0 }
 0x2fa   :  { %v2904_v61 = vadd.f32 %v2828_v6, %v2737_v16 }
 0x2fb   :  { %v2899_v43 = vpop.f32.mrf.mxu1  ;;  %v2830_v39 = vpop.f32.mrf.mxu0 }
 0x2fc   :  { %v2905_v17 = vadd.f32 %v2830_v39, %v2738_v60  ;;  %v2906_v1 = vadd.f32 %v2899_v43, %v2739_v50 }
 0x2fd   :  { %v2901_v13 = vpop.f32.mrf.mxu1 }
 0x2fe   :  { %v2907_v10 = vadd.f32 %v2901_v13, %v2740_v0 }
 0x301   :  { %v2995_v14 = vpop.f32.mrf.mxu0 }
 0x302   :  { %v3071_v63 = vadd.f32 %v2995_v14, %v2904_v61 }
 0x303   :  { %v3066_v49 = vpop.f32.mrf.mxu1  ;;  %v2997_v52 = vpop.f32.mrf.mxu0 }
 0x304   :  { %v3072_v11 = vadd.f32 %v2997_v52, %v2905_v17  ;;  %v3073_v28 = vadd.f32 %v3066_v49, %v2906_v1 }
 0x305   :  { %v3068_v2 = vpop.f32.mrf.mxu1 }
 0x306   :  { %v3074_v51 = vadd.f32 %v3068_v2, %v2907_v10 }
 0x309   :  { %v3162_v3 = vpop.f32.mrf.mxu0 }
 0x30a   :  { %v3238_v29 = vadd.f32 %v3162_v3, %v3071_v63 }
 0x30b   :  { %v3164_v32 = vpop.f32.mrf.mxu0  ;;  %v3233_v21 = vpop.f32.mrf.mxu1 }
 0x30c   :  { %v3243_v12 = vmul.f32 %v3242_v4, %v3238_v29  ;;  %v3239_v33 = vadd.f32 %v3164_v32, %v3072_v11  ;;  %v3240_v36 = vadd.f32 %v3233_v21, %v3073_v28 }
 0x30d   :  { %v3235_v15 = vpop.f32.mrf.mxu1 }
 0x30e   :  { %v3248_v62 = vadd.f32 %v3247_v31, %v3243_v12  ;;  %v3244_v41 = vmul.f32 %v3242_v4, %v3239_v33  ;;  %v3245_v54 = vmul.f32 %v3242_v4, %v3240_v36  ;;  %v3241_v9 = vadd.f32 %v3235_v15, %v3074_v51 }
 0x310   :  { %v3252_v18 = vadd.f32 %v3343_v38, %v3248_v62  ;;  %v3249_v19 = vadd.f32 %v3247_v31, %v3244_v41  ;;  %v3250_v55 = vadd.f32 %v3247_v31, %v3245_v54  ;;  %v3246_v57 = vmul.f32 %v3242_v4, %v3241_v9 }
 0x312   :  { %v3256_v56 = vmax.f32 %v3252_v18, 0.0  ;;  %v3253_v44 = vadd.f32 %v3344_v22, %v3249_v19  ;;  %v3254_v5 = vadd.f32 %v3345_v8, %v3250_v55  ;;  %v3251_v23 = vadd.f32 %v3247_v31, %v3246_v57 }
 0x314   :  { %3260 = vst [vmem:[%s4076_s5] sm:$0xff] %v3256_v56  ;;  %v3257_v59 = vmax.f32 %v3253_v44, 0.0  ;;  %v3258_v24 = vmax.f32 %v3254_v5, 0.0  ;;  %v3255_v35 = vadd.f32 %v3346_v20, %v3251_v23 }
 0x316   :  { %3261 = vst [vmem:[%s4076_s5 + $0x8] sm:$0xff] %v3257_v59  ;;  %3262 = vst [vmem:[%s4076_s5 + $0x10] sm:$0xff] %v3258_v24  ;;  %v3259_v37 = vmax.f32 %v3255_v35, 0.0 }
 0x318   :  { %3263 = vst [vmem:[%s4076_s5 + $0x18] sm:$0xff] %v3259_v37 }
 0x319   :  { %3268 = vsyncpa [#allocation3], 1 }

</bundles_post_ra>
